<compile_context>
chip_gen: v7x
topology: tpu7x:2x2x1
jax: 0.10.0
libtpu: 0.0.40
codegen_flags: <defaults>
</compile_context>

<pallas_src>
import jax
import jax.numpy as jnp
from jax.experimental import pallas as pl
from jax.experimental.pallas import tpu as pltpu


# ---------------------------------------------------------------------------
# Fused forward kernel (single invocation, everything resident in VMEM/SMEM).
# ---------------------------------------------------------------------------
def _osic_fused_kernel(x_ref, tab_ref, wc_ref, bc_ref,
                       projw_ref, projb_ref, fchead_ref,
                       m1w_ref, m1b_ref, m2w_ref, m2b_ref,
                       ow2_ref, ob_ref, o_ref, xpad_s):
    B, H, W = x_ref.shape
    Ho, Wo = H, W                                  # stride-1 conv output extent
    n_pool = ((Ho + 1) // 2) * ((Wo + 1) // 2)     # number of stride-2 outputs
    inv_n = 1.0 / float(n_pool)

    # --- in-kernel zero padding (conv padding=1): memset scratch + interior --
    xpad_s[...] = jnp.zeros_like(xpad_s)
    xpad_s[:, 1:H + 1, 1:W + 1] = x_ref[...]

    # Stride-2 conv outputs are exactly the even (row, col) positions of the
    # stride-1 output grid -> masked spatial mean implements conv-s2 + GAP.
    ri = jax.lax.broadcasted_iota(jnp.int32, (Ho, Wo), 0)
    ci = jax.lax.broadcasted_iota(jnp.int32, (Ho, Wo), 1)
    mask = jnp.logical_and((ri & 1) == 0, (ci & 1) == 0).astype(jnp.float32)

    # --- conv(1->3) + folded BN2d + ReLU + GAP: 9 shifted VPU FMAs -----------
    accs = [None, None, None]
    for kh in range(3):
        for kw in range(3):
            patch = xpad_s[:, kh:kh + Ho, kw:kw + Wo]            # (B, Ho, Wo)
            for c in range(3):
                term = wc_ref[c * 9 + kh * 3 + kw] * patch       # scalar bcast
                accs[c] = term if accs[c] is None else accs[c] + term

    gaps = []
    for c in range(3):
        y = jnp.maximum(accs[c] + bc_ref[c], 0.0)                # bias+BN folded
        s = jnp.sum(y * mask, axis=-1)                           # (B, Ho)
        gaps.append(jnp.sum(s, axis=-1, keepdims=True) * inv_n)  # (B, 1)

    # --- EfficientNet stand-in: 3 -> 1536 projection (broadcast FMA) + ReLU --
    # TODO(synk): pretrained EfficientNet MBConv backbone is not reproduced;
    # replaced by GAP + a deterministic linear projection to the 1536-d
    # feature vector that feeds model._fc.
    feat = (gaps[0] * projw_ref[0:1, :] + gaps[1] * projw_ref[1:2, :]
            + gaps[2] * projw_ref[2:3, :] + projb_ref[...])      # (B, 1536)
    feat = jnp.maximum(feat, 0.0)

    # --- _fc folded with output-head column: f32 VPU mul + lane reduce -------
    img_head = jnp.sum(feat * fchead_ref[...], axis=-1, keepdims=True)  # (B, 1)

    # --- meta layer 1: 4 -> 500 (padded 512), BN1d folded, f32 VPU FMAs ------
    t = (tab_ref[:, 0:1] * m1w_ref[0:1, :] + tab_ref[:, 1:2] * m1w_ref[1:2, :]
         + tab_ref[:, 2:3] * m1w_ref[2:3, :] + tab_ref[:, 3:4] * m1w_ref[3:4, :]
         + m1b_ref[...])
    t = jnp.maximum(t, 0.0)                                      # (B, 512)

    # --- meta layer 2: 512 -> 250 (padded 256), BN2d folded, bf16 MXU --------
    t2 = jnp.dot(t.astype(jnp.bfloat16), m2w_ref[...],
                 preferred_element_type=jnp.float32) + m2b_ref[...]
    t2 = jnp.maximum(t2, 0.0)                                    # (B, 256)

    # --- output-head column for meta branch: f32 VPU mul + lane reduce -------
    t_head = jnp.sum(t2 * ow2_ref[...], axis=-1, keepdims=True)  # (B, 1)

    o_ref[...] = (img_head + t_head + ob_ref[0]).astype(o_ref.dtype)


# ---------------------------------------------------------------------------
# Forward wrapper: one grid-less pallas_call.
# ---------------------------------------------------------------------------
def osic_forward(pp, x, tab):
    B, C, H, W = x.shape
    assert C == 1
    x3d = x.reshape(B, H, W)     # layout-preserving; padding happens in-kernel

    def vmem():
        return pl.BlockSpec(memory_space=pltpu.MemorySpace.VMEM)

    def smem():
        return pl.BlockSpec(memory_space=pltpu.MemorySpace.SMEM)

    return pl.pallas_call(
        _osic_fused_kernel,
        out_shape=jax.ShapeDtypeStruct((B, 1), jnp.float32),
        in_specs=[
            vmem(),   # x3d     (B, H, W) f32
            vmem(),   # tab     (B, 4) f32
            smem(),   # wc      (27,) f32  conv weights * BN scale
            smem(),   # bc      (3,)  f32  conv bias folded with BN
            vmem(),   # projw   (3, 1536) f32
            vmem(),   # projb   (1, 1536) f32
            vmem(),   # fc_head (1, 1536) f32  = fc_w @ out_w[:500]
            vmem(),   # m1w     (4, 512) f32 (BN1 folded)
            vmem(),   # m1b     (1, 512) f32
            vmem(),   # m2w     (512, 256) bf16 (BN2 folded)
            vmem(),   # m2b     (1, 256) f32
            vmem(),   # ow2     (1, 256) f32
            smem(),   # ob      (1,) f32  = fc_b @ out_w[:500] + out_b
        ],
        out_specs=vmem(),
        scratch_shapes=[pltpu.VMEM((B, H + 2, W + 2), jnp.float32)],
    )(x3d, tab, pp["wc"], pp["bc"], pp["projw"], pp["projb"], pp["fc_head"],
      pp["m1w"], pp["m1b"], pp["m2w"], pp["m2b"], pp["ow2"], pp["ob"])


# ---------------------------------------------------------------------------
# Parameter init (deterministic, synthetic — no checkpoint loading).
# ---------------------------------------------------------------------------
def init_params(key):
    def nrm(k, shape, s=0.05):
        return s * jax.random.normal(k, shape, jnp.float32)

    ks = iter(jax.random.split(key, 32))
    p = {}
    # self.input = nn.Conv2d(1, 3, kernel_size=3, padding=1, stride=2)
    p["conv_w"] = nrm(next(ks), (3, 1, 3, 3), 0.2)       # PyTorch (out,in,kh,kw)
    p["conv_b"] = nrm(next(ks), (3,), 0.1)
    # self.bn = nn.BatchNorm2d(3)  (eval-mode running stats)
    p["bn2d_gamma"] = 1.0 + nrm(next(ks), (3,), 0.1)
    p["bn2d_beta"] = nrm(next(ks), (3,), 0.1)
    p["bn2d_mean"] = nrm(next(ks), (3,), 0.1)
    p["bn2d_var"] = 1.0 + jnp.abs(nrm(next(ks), (3,), 0.1))
    # TODO(synk): EfficientNet backbone (pretrained MBConv stack) replaced by
    # GAP + deterministic 3 -> 1536 linear projection.
    p["proj_w"] = nrm(next(ks), (3, 1536))
    p["proj_b"] = nrm(next(ks), (1536,))
    # self.model._fc = nn.Linear(1536, 500)
    p["fc_w"] = nrm(next(ks), (1536, 500))
    p["fc_b"] = nrm(next(ks), (500,))
    # self.meta: Linear(4,500)+BN1d(500)+ReLU+Dropout+Linear(500,250)+BN1d(250)+ReLU+Dropout
    p["m1_w"] = nrm(next(ks), (4, 500))
    p["m1_b"] = nrm(next(ks), (500,))
    p["bn1_gamma"] = 1.0 + nrm(next(ks), (500,), 0.1)
    p["bn1_beta"] = nrm(next(ks), (500,), 0.1)
    p["bn1_mean"] = nrm(next(ks), (500,), 0.1)
    p["bn1_var"] = 1.0 + jnp.abs(nrm(next(ks), (500,), 0.1))
    p["m2_w"] = nrm(next(ks), (500, 250))
    p["m2_b"] = nrm(next(ks), (250,))
    p["bn2_gamma"] = 1.0 + nrm(next(ks), (250,), 0.1)
    p["bn2_beta"] = nrm(next(ks), (250,), 0.1)
    p["bn2_mean"] = nrm(next(ks), (250,), 0.1)
    p["bn2_var"] = 1.0 + jnp.abs(nrm(next(ks), (250,), 0.1))
    # self.output = nn.Linear(500 + 250, 1)
    p["out_w"] = nrm(next(ks), (750, 1))
    p["out_b"] = nrm(next(ks), (1,))
    return p


def _bn_fold(gamma, beta, mean, var, eps=1e-5):
    scale = gamma / jnp.sqrt(var + eps)
    shift = beta - mean * scale
    return scale, shift


def prepare_params(p):
    """Fold BN + the (_fc -> output) linear composition into weights/bias,
    pad feature dims to 128 multiples, cast the one MXU weight to bf16.
    Runs ONCE, outside jit."""
    f32, bf16 = jnp.float32, jnp.bfloat16

    def pad_cols(a, n):
        return jnp.pad(a, ((0, 0), (0, n - a.shape[1])))

    def pad_rows(a, n):
        return jnp.pad(a, ((0, n - a.shape[0]), (0, 0)))

    def pad_vec(v, n):
        return jnp.pad(v, (0, n - v.shape[0]))

    # conv + BN2d fold  (tap order of the 9 weights = c*9 + kh*3 + kw)
    sc2d, sh2d = _bn_fold(p["bn2d_gamma"], p["bn2d_beta"],
                          p["bn2d_mean"], p["bn2d_var"])
    conv_w = p["conv_w"].reshape(3, 9)
    wc = (conv_w * sc2d[:, None]).reshape(-1).astype(f32)          # (27,)
    bc = (p["conv_b"] * sc2d + sh2d).astype(f32)                   # (3,)

    projw = p["proj_w"].astype(f32)                                # (3, 1536)
    projb = p["proj_b"].reshape(1, -1).astype(f32)                 # (1, 1536)

    # _fc folded into the output head (exact linear composition; no activation
    # between _fc and the output Linear in the original model).
    ow1 = p["out_w"][:500]                                         # (500, 1)
    fc_head = jnp.matmul(p["fc_w"], ow1).reshape(1, -1).astype(f32)  # (1, 1536)
    fc_head_b = jnp.dot(p["fc_b"], ow1[:, 0])                      # scalar

    sc1, sh1 = _bn_fold(p["bn1_gamma"], p["bn1_beta"],
                        p["bn1_mean"], p["bn1_var"])
    m1w = pad_cols(p["m1_w"] * sc1[None, :], 512).astype(f32)      # (4, 512)
    m1b = pad_vec(p["m1_b"] * sc1 + sh1, 512).reshape(1, -1).astype(f32)

    sc2, sh2 = _bn_fold(p["bn2_gamma"], p["bn2_beta"],
                        p["bn2_mean"], p["bn2_var"])
    m2w = pad_rows(pad_cols(p["m2_w"] * sc2[None, :], 256), 512).astype(bf16)
    m2b = pad_vec(p["m2_b"] * sc2 + sh2, 256).reshape(1, -1).astype(f32)

    ow2 = pad_vec(p["out_w"][500:, 0], 256).reshape(1, -1).astype(f32)  # (1,256)
    ob = (fc_head_b + p["out_b"][0]).reshape(1).astype(f32)        # (1,)

    return dict(wc=wc, bc=bc, projw=projw, projb=projb, fc_head=fc_head,
                m1w=m1w, m1b=m1b, m2w=m2w, m2b=m2b, ow2=ow2, ob=ob)


# ---------------------------------------------------------------------------
# Pure-JAX f32 reference (unfolded math) for a tolerance check.
# ---------------------------------------------------------------------------
def reference_forward(p, x, tab, eps=1e-5):
    y = jax.lax.conv_general_dilated(
        x, p["conv_w"], window_strides=(2, 2), padding=((1, 1), (1, 1)),
        dimension_numbers=("NCHW", "OIHW", "NCHW"))
    y = y + p["conv_b"][None, :, None, None]
    sc = (p["bn2d_gamma"] / jnp.sqrt(p["bn2d_var"] + eps))
    y = ((y - p["bn2d_mean"][None, :, None, None]) * sc[None, :, None, None]
         + p["bn2d_beta"][None, :, None, None])
    y = jnp.maximum(y, 0.0)
    g = jnp.mean(y, axis=(2, 3))                                   # (B, 3)
    feat = jnp.maximum(g @ p["proj_w"] + p["proj_b"], 0.0)         # (B, 1536)
    x_img = feat @ p["fc_w"] + p["fc_b"]                           # (B, 500)
    t = tab @ p["m1_w"] + p["m1_b"]
    sc1 = p["bn1_gamma"] / jnp.sqrt(p["bn1_var"] + eps)
    t = jnp.maximum((t - p["bn1_mean"]) * sc1 + p["bn1_beta"], 0.0)
    t = t @ p["m2_w"] + p["m2_b"]
    sc2 = p["bn2_gamma"] / jnp.sqrt(p["bn2_var"] + eps)
    t = jnp.maximum((t - p["bn2_mean"]) * sc2 + p["bn2_beta"], 0.0)
    cat = jnp.concatenate([x_img, t], axis=1)                      # (B, 750)
    return cat @ p["out_w"] + p["out_b"]


if __name__ == "__main__":
    key = jax.random.PRNGKey(0)
    kx, kt, kp = jax.random.split(key, 3)
    x = jax.random.normal(kx, (2, 1, 16, 16), jnp.float32)   # (B, 1, H, W) NCHW
    tab = jax.random.normal(kt, (2, 4), jnp.float32)         # (B, 4) tabular
    params = init_params(kp)
    pp = prepare_params(params)                               # fold/pad/cast once

    out = jax.jit(osic_forward)(pp, x, tab)
    out = jax.block_until_ready(out)
    assert out.shape == (2, 1) and out.dtype == jnp.float32

    ref = reference_forward(params, x, tab)
    assert jnp.allclose(out, ref, rtol=5e-2, atol=1e-2), (out, ref)
    print("KERNEL_OK")
</pallas_src>

<mosaic_0001>
module attributes {stable_mosaic.version = 11 : i64} {
  func.func @_osic_fused_kernel(%arg0: memref<2x16x16xf32, #tpu.memory_space<vmem>>, %arg1: memref<2x4xf32, #tpu.memory_space<vmem>>, %arg2: memref<27xf32, #tpu.memory_space<smem>>, %arg3: memref<3xf32, #tpu.memory_space<smem>>, %arg4: memref<3x1536xf32, #tpu.memory_space<vmem>>, %arg5: memref<1x1536xf32, #tpu.memory_space<vmem>>, %arg6: memref<1x1536xf32, #tpu.memory_space<vmem>>, %arg7: memref<4x512xf32, #tpu.memory_space<vmem>>, %arg8: memref<1x512xf32, #tpu.memory_space<vmem>>, %arg9: memref<512x256xbf16, #tpu.memory_space<vmem>>, %arg10: memref<1x256xf32, #tpu.memory_space<vmem>>, %arg11: memref<1x256xf32, #tpu.memory_space<vmem>>, %arg12: memref<1xf32, #tpu.memory_space<smem>>, %arg13: memref<2x1xf32, #tpu.memory_space<vmem>>, %arg14: memref<2x18x18xf32, #tpu.memory_space<vmem>>) attributes {dimension_semantics = [], scalar_prefetch = 0 : i64, scratch_operands = 1 : i64, tpu.core_type = #tpu.core_type<tc>} {
    %cst = arith.constant 0.000000e+00 : f32
    %0 = vector.broadcast %cst : f32 to vector<2x18x18xf32>
    %c0 = arith.constant 0 : index
    %c0_0 = arith.constant 0 : index
    %c0_1 = arith.constant 0 : index
    %1 = vector.load %arg14[%c0, %c0_0, %c0_1] : memref<2x18x18xf32, #tpu.memory_space<vmem>>, vector<2x18x18xf32>
    tpu.vector_store %arg14[%c0, %c0_0, %c0_1], %0 {strides = array<i32>} : memref<2x18x18xf32, #tpu.memory_space<vmem>>, vector<2x18x18xf32>,
    %c0_2 = arith.constant 0 : index
    %c0_3 = arith.constant 0 : index
    %c0_4 = arith.constant 0 : index
    %2 = vector.load %arg0[%c0_2, %c0_3, %c0_4] : memref<2x16x16xf32, #tpu.memory_space<vmem>>, vector<2x16x16xf32>
    %c0_5 = arith.constant 0 : index
    %c1 = arith.constant 1 : index
    %c1_6 = arith.constant 1 : index
    %3 = vector.load %arg14[%c0_5, %c1, %c1_6] : memref<2x18x18xf32, #tpu.memory_space<vmem>>, vector<2x16x16xf32>
    tpu.vector_store %arg14[%c0_5, %c1, %c1_6], %2 {strides = array<i32>} : memref<2x18x18xf32, #tpu.memory_space<vmem>>, vector<2x16x16xf32>,
    %4 = tpu.iota {dimensions = array<i32: 0>} : vector<16x16xi32>
    %5 = tpu.iota {dimensions = array<i32: 1>} : vector<16x16xi32>
    %c1_i32 = arith.constant 1 : i32
    %6 = vector.broadcast %c1_i32 : i32 to vector<16x16xi32>
    %7 = arith.andi %4, %6 : vector<16x16xi32>
    %c0_i32 = arith.constant 0 : i32
    %8 = vector.broadcast %c0_i32 : i32 to vector<16x16xi32>
    %9 = arith.cmpi eq, %7, %8 : vector<16x16xi32>
    %c1_i32_7 = arith.constant 1 : i32
    %10 = vector.broadcast %c1_i32_7 : i32 to vector<16x16xi32>
    %11 = arith.andi %5, %10 : vector<16x16xi32>
    %c0_i32_8 = arith.constant 0 : i32
    %12 = vector.broadcast %c0_i32_8 : i32 to vector<16x16xi32>
    %13 = arith.cmpi eq, %11, %12 : vector<16x16xi32>
    %14 = arith.andi %9, %13 : vector<16x16xi1>
    %15 = arith.extui %14 : vector<16x16xi1> to vector<16x16xi32>
    %16 = arith.sitofp %15 : vector<16x16xi32> to vector<16x16xf32>
    %c0_9 = arith.constant 0 : index
    %c0_10 = arith.constant 0 : index
    %c0_11 = arith.constant 0 : index
    %17 = vector.load %arg14[%c0_9, %c0_10, %c0_11] : memref<2x18x18xf32, #tpu.memory_space<vmem>>, vector<2x16x16xf32>
    %c0_12 = arith.constant 0 : index
    %18 = memref.load %arg2[%c0_12] : memref<27xf32, #tpu.memory_space<smem>>
    %19 = vector.broadcast %18 : f32 to vector<2x16x16xf32>
    %20 = arith.mulf %19, %17 : vector<2x16x16xf32>
    %c9 = arith.constant 9 : index
    %21 = memref.load %arg2[%c9] : memref<27xf32, #tpu.memory_space<smem>>
    %22 = vector.broadcast %21 : f32 to vector<2x16x16xf32>
    %23 = arith.mulf %22, %17 : vector<2x16x16xf32>
    %c18 = arith.constant 18 : index
    %24 = memref.load %arg2[%c18] : memref<27xf32, #tpu.memory_space<smem>>
    %25 = vector.broadcast %24 : f32 to vector<2x16x16xf32>
    %26 = arith.mulf %25, %17 : vector<2x16x16xf32>
    %c0_13 = arith.constant 0 : index
    %c0_14 = arith.constant 0 : index
    %c1_15 = arith.constant 1 : index
    %27 = vector.load %arg14[%c0_13, %c0_14, %c1_15] : memref<2x18x18xf32, #tpu.memory_space<vmem>>, vector<2x16x16xf32>
    %c1_16 = arith.constant 1 : index
    %28 = memref.load %arg2[%c1_16] : memref<27xf32, #tpu.memory_space<smem>>
    %29 = vector.broadcast %28 : f32 to vector<2x16x16xf32>
    %30 = arith.mulf %29, %27 : vector<2x16x16xf32>
    %31 = arith.addf %20, %30 : vector<2x16x16xf32>
    %c10 = arith.constant 10 : index
    %32 = memref.load %arg2[%c10] : memref<27xf32, #tpu.memory_space<smem>>
    %33 = vector.broadcast %32 : f32 to vector<2x16x16xf32>
    %34 = arith.mulf %33, %27 : vector<2x16x16xf32>
    %35 = arith.addf %23, %34 : vector<2x16x16xf32>
    %c19 = arith.constant 19 : index
    %36 = memref.load %arg2[%c19] : memref<27xf32, #tpu.memory_space<smem>>
    %37 = vector.broadcast %36 : f32 to vector<2x16x16xf32>
    %38 = arith.mulf %37, %27 : vector<2x16x16xf32>
    %39 = arith.addf %26, %38 : vector<2x16x16xf32>
    %c0_17 = arith.constant 0 : index
    %c0_18 = arith.constant 0 : index
    %c2 = arith.constant 2 : index
    %40 = vector.load %arg14[%c0_17, %c0_18, %c2] : memref<2x18x18xf32, #tpu.memory_space<vmem>>, vector<2x16x16xf32>
    %c2_19 = arith.constant 2 : index
    %41 = memref.load %arg2[%c2_19] : memref<27xf32, #tpu.memory_space<smem>>
    %42 = vector.broadcast %41 : f32 to vector<2x16x16xf32>
    %43 = arith.mulf %42, %40 : vector<2x16x16xf32>
    %44 = arith.addf %31, %43 : vector<2x16x16xf32>
    %c11 = arith.constant 11 : index
    %45 = memref.load %arg2[%c11] : memref<27xf32, #tpu.memory_space<smem>>
    %46 = vector.broadcast %45 : f32 to vector<2x16x16xf32>
    %47 = arith.mulf %46, %40 : vector<2x16x16xf32>
    %48 = arith.addf %35, %47 : vector<2x16x16xf32>
    %c20 = arith.constant 20 : index
    %49 = memref.load %arg2[%c20] : memref<27xf32, #tpu.memory_space<smem>>
    %50 = vector.broadcast %49 : f32 to vector<2x16x16xf32>
    %51 = arith.mulf %50, %40 : vector<2x16x16xf32>
    %52 = arith.addf %39, %51 : vector<2x16x16xf32>
    %c0_20 = arith.constant 0 : index
    %c1_21 = arith.constant 1 : index
    %c0_22 = arith.constant 0 : index
    %53 = vector.load %arg14[%c0_20, %c1_21, %c0_22] : memref<2x18x18xf32, #tpu.memory_space<vmem>>, vector<2x16x16xf32>
    %c3 = arith.constant 3 : index
    %54 = memref.load %arg2[%c3] : memref<27xf32, #tpu.memory_space<smem>>
    %55 = vector.broadcast %54 : f32 to vector<2x16x16xf32>
    %56 = arith.mulf %55, %53 : vector<2x16x16xf32>
    %57 = arith.addf %44, %56 : vector<2x16x16xf32>
    %c12 = arith.constant 12 : index
    %58 = memref.load %arg2[%c12] : memref<27xf32, #tpu.memory_space<smem>>
    %59 = vector.broadcast %58 : f32 to vector<2x16x16xf32>
    %60 = arith.mulf %59, %53 : vector<2x16x16xf32>
    %61 = arith.addf %48, %60 : vector<2x16x16xf32>
    %c21 = arith.constant 21 : index
    %62 = memref.load %arg2[%c21] : memref<27xf32, #tpu.memory_space<smem>>
    %63 = vector.broadcast %62 : f32 to vector<2x16x16xf32>
    %64 = arith.mulf %63, %53 : vector<2x16x16xf32>
    %65 = arith.addf %52, %64 : vector<2x16x16xf32>
    %c0_23 = arith.constant 0 : index
    %c1_24 = arith.constant 1 : index
    %c1_25 = arith.constant 1 : index
    %66 = vector.load %arg14[%c0_23, %c1_24, %c1_25] : memref<2x18x18xf32, #tpu.memory_space<vmem>>, vector<2x16x16xf32>
    %c4 = arith.constant 4 : index
    %67 = memref.load %arg2[%c4] : memref<27xf32, #tpu.memory_space<smem>>
    %68 = vector.broadcast %67 : f32 to vector<2x16x16xf32>
    %69 = arith.mulf %68, %66 : vector<2x16x16xf32>
    %70 = arith.addf %57, %69 : vector<2x16x16xf32>
    %c13 = arith.constant 13 : index
    %71 = memref.load %arg2[%c13] : memref<27xf32, #tpu.memory_space<smem>>
    %72 = vector.broadcast %71 : f32 to vector<2x16x16xf32>
    %73 = arith.mulf %72, %66 : vector<2x16x16xf32>
    %74 = arith.addf %61, %73 : vector<2x16x16xf32>
    %c22 = arith.constant 22 : index
    %75 = memref.load %arg2[%c22] : memref<27xf32, #tpu.memory_space<smem>>
    %76 = vector.broadcast %75 : f32 to vector<2x16x16xf32>
    %77 = arith.mulf %76, %66 : vector<2x16x16xf32>
    %78 = arith.addf %65, %77 : vector<2x16x16xf32>
    %c0_26 = arith.constant 0 : index
    %c1_27 = arith.constant 1 : index
    %c2_28 = arith.constant 2 : index
    %79 = vector.load %arg14[%c0_26, %c1_27, %c2_28] : memref<2x18x18xf32, #tpu.memory_space<vmem>>, vector<2x16x16xf32>
    %c5 = arith.constant 5 : index
    %80 = memref.load %arg2[%c5] : memref<27xf32, #tpu.memory_space<smem>>
    %81 = vector.broadcast %80 : f32 to vector<2x16x16xf32>
    %82 = arith.mulf %81, %79 : vector<2x16x16xf32>
    %83 = arith.addf %70, %82 : vector<2x16x16xf32>
    %c14 = arith.constant 14 : index
    %84 = memref.load %arg2[%c14] : memref<27xf32, #tpu.memory_space<smem>>
    %85 = vector.broadcast %84 : f32 to vector<2x16x16xf32>
    %86 = arith.mulf %85, %79 : vector<2x16x16xf32>
    %87 = arith.addf %74, %86 : vector<2x16x16xf32>
    %c23 = arith.constant 23 : index
    %88 = memref.load %arg2[%c23] : memref<27xf32, #tpu.memory_space<smem>>
    %89 = vector.broadcast %88 : f32 to vector<2x16x16xf32>
    %90 = arith.mulf %89, %79 : vector<2x16x16xf32>
    %91 = arith.addf %78, %90 : vector<2x16x16xf32>
    %c0_29 = arith.constant 0 : index
    %c2_30 = arith.constant 2 : index
    %c0_31 = arith.constant 0 : index
    %92 = vector.load %arg14[%c0_29, %c2_30, %c0_31] : memref<2x18x18xf32, #tpu.memory_space<vmem>>, vector<2x16x16xf32>
    %c6 = arith.constant 6 : index
    %93 = memref.load %arg2[%c6] : memref<27xf32, #tpu.memory_space<smem>>
    %94 = vector.broadcast %93 : f32 to vector<2x16x16xf32>
    %95 = arith.mulf %94, %92 : vector<2x16x16xf32>
    %96 = arith.addf %83, %95 : vector<2x16x16xf32>
    %c15 = arith.constant 15 : index
    %97 = memref.load %arg2[%c15] : memref<27xf32, #tpu.memory_space<smem>>
    %98 = vector.broadcast %97 : f32 to vector<2x16x16xf32>
    %99 = arith.mulf %98, %92 : vector<2x16x16xf32>
    %100 = arith.addf %87, %99 : vector<2x16x16xf32>
    %c24 = arith.constant 24 : index
    %101 = memref.load %arg2[%c24] : memref<27xf32, #tpu.memory_space<smem>>
    %102 = vector.broadcast %101 : f32 to vector<2x16x16xf32>
    %103 = arith.mulf %102, %92 : vector<2x16x16xf32>
    %104 = arith.addf %91, %103 : vector<2x16x16xf32>
    %c0_32 = arith.constant 0 : index
    %c2_33 = arith.constant 2 : index
    %c1_34 = arith.constant 1 : index
    %105 = vector.load %arg14[%c0_32, %c2_33, %c1_34] : memref<2x18x18xf32, #tpu.memory_space<vmem>>, vector<2x16x16xf32>
    %c7 = arith.constant 7 : index
    %106 = memref.load %arg2[%c7] : memref<27xf32, #tpu.memory_space<smem>>
    %107 = vector.broadcast %106 : f32 to vector<2x16x16xf32>
    %108 = arith.mulf %107, %105 : vector<2x16x16xf32>
    %109 = arith.addf %96, %108 : vector<2x16x16xf32>
    %c16 = arith.constant 16 : index
    %110 = memref.load %arg2[%c16] : memref<27xf32, #tpu.memory_space<smem>>
    %111 = vector.broadcast %110 : f32 to vector<2x16x16xf32>
    %112 = arith.mulf %111, %105 : vector<2x16x16xf32>
    %113 = arith.addf %100, %112 : vector<2x16x16xf32>
    %c25 = arith.constant 25 : index
    %114 = memref.load %arg2[%c25] : memref<27xf32, #tpu.memory_space<smem>>
    %115 = vector.broadcast %114 : f32 to vector<2x16x16xf32>
    %116 = arith.mulf %115, %105 : vector<2x16x16xf32>
    %117 = arith.addf %104, %116 : vector<2x16x16xf32>
    %c0_35 = arith.constant 0 : index
    %c2_36 = arith.constant 2 : index
    %c2_37 = arith.constant 2 : index
    %118 = vector.load %arg14[%c0_35, %c2_36, %c2_37] : memref<2x18x18xf32, #tpu.memory_space<vmem>>, vector<2x16x16xf32>
    %c8 = arith.constant 8 : index
    %119 = memref.load %arg2[%c8] : memref<27xf32, #tpu.memory_space<smem>>
    %120 = vector.broadcast %119 : f32 to vector<2x16x16xf32>
    %121 = arith.mulf %120, %118 : vector<2x16x16xf32>
    %122 = arith.addf %109, %121 : vector<2x16x16xf32>
    %c17 = arith.constant 17 : index
    %123 = memref.load %arg2[%c17] : memref<27xf32, #tpu.memory_space<smem>>
    %124 = vector.broadcast %123 : f32 to vector<2x16x16xf32>
    %125 = arith.mulf %124, %118 : vector<2x16x16xf32>
    %126 = arith.addf %113, %125 : vector<2x16x16xf32>
    %c26 = arith.constant 26 : index
    %127 = memref.load %arg2[%c26] : memref<27xf32, #tpu.memory_space<smem>>
    %128 = vector.broadcast %127 : f32 to vector<2x16x16xf32>
    %129 = arith.mulf %128, %118 : vector<2x16x16xf32>
    %130 = arith.addf %117, %129 : vector<2x16x16xf32>
    %c0_38 = arith.constant 0 : index
    %131 = memref.load %arg3[%c0_38] : memref<3xf32, #tpu.memory_space<smem>>
    %132 = vector.broadcast %131 : f32 to vector<2x16x16xf32>
    %133 = arith.addf %122, %132 : vector<2x16x16xf32>
    %cst_39 = arith.constant 0.000000e+00 : f32
    %134 = vector.broadcast %cst_39 : f32 to vector<2x16x16xf32>
    %135 = arith.maximumf %133, %134 : vector<2x16x16xf32>
    %136 = vector.shape_cast %16 : vector<16x16xf32> to vector<1x16x16xf32>
    %137 = vector.broadcast %136 : vector<1x16x16xf32> to vector<2x16x16xf32>
    %138 = arith.mulf %135, %137 : vector<2x16x16xf32>
    %cst_40 = arith.constant dense<0.000000e+00> : vector<2x16xf32>
    %139 = vector.multi_reduction <add>, %138, %cst_40 [2] : vector<2x16x16xf32> to vector<2x16xf32>
    %cst_41 = arith.constant dense<0.000000e+00> : vector<2xf32>
    %140 = vector.multi_reduction <add>, %139, %cst_41 [1] : vector<2x16xf32> to vector<2xf32>
    %141 = vector.shape_cast %140 : vector<2xf32> to vector<2x1xf32>
    %cst_42 = arith.constant 1.562500e-02 : f32
    %142 = vector.broadcast %cst_42 : f32 to vector<2x1xf32>
    %143 = arith.mulf %141, %142 : vector<2x1xf32>
    %c1_43 = arith.constant 1 : index
    %144 = memref.load %arg3[%c1_43] : memref<3xf32, #tpu.memory_space<smem>>
    %145 = vector.broadcast %144 : f32 to vector<2x16x16xf32>
    %146 = arith.addf %126, %145 : vector<2x16x16xf32>
    %cst_44 = arith.constant 0.000000e+00 : f32
    %147 = vector.broadcast %cst_44 : f32 to vector<2x16x16xf32>
    %148 = arith.maximumf %146, %147 : vector<2x16x16xf32>
    %149 = vector.shape_cast %16 : vector<16x16xf32> to vector<1x16x16xf32>
    %150 = vector.broadcast %149 : vector<1x16x16xf32> to vector<2x16x16xf32>
    %151 = arith.mulf %148, %150 : vector<2x16x16xf32>
    %cst_45 = arith.constant dense<0.000000e+00> : vector<2x16xf32>
    %152 = vector.multi_reduction <add>, %151, %cst_45 [2] : vector<2x16x16xf32> to vector<2x16xf32>
    %cst_46 = arith.constant dense<0.000000e+00> : vector<2xf32>
    %153 = vector.multi_reduction <add>, %152, %cst_46 [1] : vector<2x16xf32> to vector<2xf32>
    %154 = vector.shape_cast %153 : vector<2xf32> to vector<2x1xf32>
    %cst_47 = arith.constant 1.562500e-02 : f32
    %155 = vector.broadcast %cst_47 : f32 to vector<2x1xf32>
    %156 = arith.mulf %154, %155 : vector<2x1xf32>
    %c2_48 = arith.constant 2 : index
    %157 = memref.load %arg3[%c2_48] : memref<3xf32, #tpu.memory_space<smem>>
    %158 = vector.broadcast %157 : f32 to vector<2x16x16xf32>
    %159 = arith.addf %130, %158 : vector<2x16x16xf32>
    %cst_49 = arith.constant 0.000000e+00 : f32
    %160 = vector.broadcast %cst_49 : f32 to vector<2x16x16xf32>
    %161 = arith.maximumf %159, %160 : vector<2x16x16xf32>
    %162 = vector.shape_cast %16 : vector<16x16xf32> to vector<1x16x16xf32>
    %163 = vector.broadcast %162 : vector<1x16x16xf32> to vector<2x16x16xf32>
    %164 = arith.mulf %161, %163 : vector<2x16x16xf32>
    %cst_50 = arith.constant dense<0.000000e+00> : vector<2x16xf32>
    %165 = vector.multi_reduction <add>, %164, %cst_50 [2] : vector<2x16x16xf32> to vector<2x16xf32>
    %cst_51 = arith.constant dense<0.000000e+00> : vector<2xf32>
    %166 = vector.multi_reduction <add>, %165, %cst_51 [1] : vector<2x16xf32> to vector<2xf32>
    %167 = vector.shape_cast %166 : vector<2xf32> to vector<2x1xf32>
    %cst_52 = arith.constant 1.562500e-02 : f32
    %168 = vector.broadcast %cst_52 : f32 to vector<2x1xf32>
    %169 = arith.mulf %167, %168 : vector<2x1xf32>
    %c0_53 = arith.constant 0 : index
    %c0_54 = arith.constant 0 : index
    %170 = vector.load %arg4[%c0_53, %c0_54] : memref<3x1536xf32, #tpu.memory_space<vmem>>, vector<1x1536xf32>
    %171 = vector.broadcast %143 : vector<2x1xf32> to vector<2x1536xf32>
    %172 = vector.broadcast %170 : vector<1x1536xf32> to vector<2x1536xf32>
    %173 = arith.mulf %171, %172 : vector<2x1536xf32>
    %c1_55 = arith.constant 1 : index
    %c0_56 = arith.constant 0 : index
    %174 = vector.load %arg4[%c1_55, %c0_56] : memref<3x1536xf32, #tpu.memory_space<vmem>>, vector<1x1536xf32>
    %175 = vector.broadcast %156 : vector<2x1xf32> to vector<2x1536xf32>
    %176 = vector.broadcast %174 : vector<1x1536xf32> to vector<2x1536xf32>
    %177 = arith.mulf %175, %176 : vector<2x1536xf32>
    %178 = arith.addf %173, %177 : vector<2x1536xf32>
    %c2_57 = arith.constant 2 : index
    %c0_58 = arith.constant 0 : index
    %179 = vector.load %arg4[%c2_57, %c0_58] : memref<3x1536xf32, #tpu.memory_space<vmem>>, vector<1x1536xf32>
    %180 = vector.broadcast %169 : vector<2x1xf32> to vector<2x1536xf32>
    %181 = vector.broadcast %179 : vector<1x1536xf32> to vector<2x1536xf32>
    %182 = arith.mulf %180, %181 : vector<2x1536xf32>
    %183 = arith.addf %178, %182 : vector<2x1536xf32>
    %c0_59 = arith.constant 0 : index
    %c0_60 = arith.constant 0 : index
    %184 = vector.load %arg5[%c0_59, %c0_60] : memref<1x1536xf32, #tpu.memory_space<vmem>>, vector<1x1536xf32>
    %185 = vector.broadcast %184 : vector<1x1536xf32> to vector<2x1536xf32>
    %186 = arith.addf %183, %185 : vector<2x1536xf32>
    %cst_61 = arith.constant 0.000000e+00 : f32
    %187 = vector.broadcast %cst_61 : f32 to vector<2x1536xf32>
    %188 = arith.maximumf %186, %187 : vector<2x1536xf32>
    %c0_62 = arith.constant 0 : index
    %c0_63 = arith.constant 0 : index
    %189 = vector.load %arg6[%c0_62, %c0_63] : memref<1x1536xf32, #tpu.memory_space<vmem>>, vector<1x1536xf32>
    %190 = vector.broadcast %189 : vector<1x1536xf32> to vector<2x1536xf32>
    %191 = arith.mulf %188, %190 : vector<2x1536xf32>
    %cst_64 = arith.constant dense<0.000000e+00> : vector<2xf32>
    %192 = vector.multi_reduction <add>, %191, %cst_64 [1] : vector<2x1536xf32> to vector<2xf32>
    %193 = vector.shape_cast %192 : vector<2xf32> to vector<2x1xf32>
    %c0_65 = arith.constant 0 : index
    %c0_66 = arith.constant 0 : index
    %194 = vector.load %arg1[%c0_65, %c0_66] : memref<2x4xf32, #tpu.memory_space<vmem>>, vector<2x1xf32>
    %c0_67 = arith.constant 0 : index
    %c0_68 = arith.constant 0 : index
    %195 = vector.load %arg7[%c0_67, %c0_68] : memref<4x512xf32, #tpu.memory_space<vmem>>, vector<1x512xf32>
    %196 = vector.broadcast %194 : vector<2x1xf32> to vector<2x512xf32>
    %197 = vector.broadcast %195 : vector<1x512xf32> to vector<2x512xf32>
    %198 = arith.mulf %196, %197 : vector<2x512xf32>
    %c0_69 = arith.constant 0 : index
    %c1_70 = arith.constant 1 : index
    %199 = vector.load %arg1[%c0_69, %c1_70] : memref<2x4xf32, #tpu.memory_space<vmem>>, vector<2x1xf32>
    %c1_71 = arith.constant 1 : index
    %c0_72 = arith.constant 0 : index
    %200 = vector.load %arg7[%c1_71, %c0_72] : memref<4x512xf32, #tpu.memory_space<vmem>>, vector<1x512xf32>
    %201 = vector.broadcast %199 : vector<2x1xf32> to vector<2x512xf32>
    %202 = vector.broadcast %200 : vector<1x512xf32> to vector<2x512xf32>
    %203 = arith.mulf %201, %202 : vector<2x512xf32>
    %204 = arith.addf %198, %203 : vector<2x512xf32>
    %c0_73 = arith.constant 0 : index
    %c2_74 = arith.constant 2 : index
    %205 = vector.load %arg1[%c0_73, %c2_74] : memref<2x4xf32, #tpu.memory_space<vmem>>, vector<2x1xf32>
    %c2_75 = arith.constant 2 : index
    %c0_76 = arith.constant 0 : index
    %206 = vector.load %arg7[%c2_75, %c0_76] : memref<4x512xf32, #tpu.memory_space<vmem>>, vector<1x512xf32>
    %207 = vector.broadcast %205 : vector<2x1xf32> to vector<2x512xf32>
    %208 = vector.broadcast %206 : vector<1x512xf32> to vector<2x512xf32>
    %209 = arith.mulf %207, %208 : vector<2x512xf32>
    %210 = arith.addf %204, %209 : vector<2x512xf32>
    %c0_77 = arith.constant 0 : index
    %c3_78 = arith.constant 3 : index
    %211 = vector.load %arg1[%c0_77, %c3_78] : memref<2x4xf32, #tpu.memory_space<vmem>>, vector<2x1xf32>
    %c3_79 = arith.constant 3 : index
    %c0_80 = arith.constant 0 : index
    %212 = vector.load %arg7[%c3_79, %c0_80] : memref<4x512xf32, #tpu.memory_space<vmem>>, vector<1x512xf32>
    %213 = vector.broadcast %211 : vector<2x1xf32> to vector<2x512xf32>
    %214 = vector.broadcast %212 : vector<1x512xf32> to vector<2x512xf32>
    %215 = arith.mulf %213, %214 : vector<2x512xf32>
    %216 = arith.addf %210, %215 : vector<2x512xf32>
    %c0_81 = arith.constant 0 : index
    %c0_82 = arith.constant 0 : index
    %217 = vector.load %arg8[%c0_81, %c0_82] : memref<1x512xf32, #tpu.memory_space<vmem>>, vector<1x512xf32>
    %218 = vector.broadcast %217 : vector<1x512xf32> to vector<2x512xf32>
    %219 = arith.addf %216, %218 : vector<2x512xf32>
    %cst_83 = arith.constant 0.000000e+00 : f32
    %220 = vector.broadcast %cst_83 : f32 to vector<2x512xf32>
    %221 = arith.maximumf %219, %220 : vector<2x512xf32>
    %222 = arith.truncf %221 : vector<2x512xf32> to vector<2x512xbf16>
    %c0_84 = arith.constant 0 : index
    %c0_85 = arith.constant 0 : index
    %223 = vector.load %arg9[%c0_84, %c0_85] : memref<512x256xbf16, #tpu.memory_space<vmem>>, vector<512x256xbf16>
    %cst_86 = arith.constant dense<0.000000e+00> : vector<2x256xf32>
    %224 = tpu.matmul %222, %223, %cst_86 {dimension_numbers = #tpu.dot_dimension_numbers<[1], [0], [0], [1], [0, 0, 1, 1], [], []>} : vector<2x512xbf16>, vector<512x256xbf16>, vector<2x256xf32> -> vector<2x256xf32>
    %c0_87 = arith.constant 0 : index
    %c0_88 = arith.constant 0 : index
    %225 = vector.load %arg10[%c0_87, %c0_88] : memref<1x256xf32, #tpu.memory_space<vmem>>, vector<1x256xf32>
    %226 = vector.broadcast %225 : vector<1x256xf32> to vector<2x256xf32>
    %227 = arith.addf %224, %226 : vector<2x256xf32>
    %cst_89 = arith.constant 0.000000e+00 : f32
    %228 = vector.broadcast %cst_89 : f32 to vector<2x256xf32>
    %229 = arith.maximumf %227, %228 : vector<2x256xf32>
    %c0_90 = arith.constant 0 : index
    %c0_91 = arith.constant 0 : index
    %230 = vector.load %arg11[%c0_90, %c0_91] : memref<1x256xf32, #tpu.memory_space<vmem>>, vector<1x256xf32>
    %231 = vector.broadcast %230 : vector<1x256xf32> to vector<2x256xf32>
    %232 = arith.mulf %229, %231 : vector<2x256xf32>
    %cst_92 = arith.constant dense<0.000000e+00> : vector<2xf32>
    %233 = vector.multi_reduction <add>, %232, %cst_92 [1] : vector<2x256xf32> to vector<2xf32>
    %234 = vector.shape_cast %233 : vector<2xf32> to vector<2x1xf32>
    %235 = arith.addf %193, %234 : vector<2x1xf32>
    %c0_93 = arith.constant 0 : index
    %236 = memref.load %arg12[%c0_93] : memref<1xf32, #tpu.memory_space<smem>>
    %237 = vector.broadcast %236 : f32 to vector<2x1xf32>
    %238 = arith.addf %235, %237 : vector<2x1xf32>
    %c0_94 = arith.constant 0 : index
    %c0_95 = arith.constant 0 : index
    %239 = vector.load %arg13[%c0_94, %c0_95] : memref<2x1xf32, #tpu.memory_space<vmem>>, vector<2x1xf32>
    tpu.vector_store %arg13[%c0_94, %c0_95], %238 {strides = array<i32>} : memref<2x1xf32, #tpu.memory_space<vmem>>, vector<2x1xf32>,
    return
  }
}

</mosaic_0001>

<bundles_post_ra>
// kernel: osic_forward.1
= control target key start
LH: loop header
LB: loop body
LE: loop exit
PB: predicated region body
PF: predicated region fallthrough
CT: control target
= control target key end

     0   :  { %19 = vsyncpa [#allocation7], 0  ;;  %s3403_s0 = inlined_call_operand.vmem [shape: f32[2,16,16], index: 0, kind: input, shape index: {}]   ;;  %s3404_s1 = inlined_call_operand.vmem [shape: f32[2,4], index: 1, kind: input, shape index: {}]   ;;  %s3405_s2 = inlined_call_operand.vmem [shape: f32[27], index: 2, kind: input, shape index: {}]   ;;  %s3406_s3 = inlined_call_operand.hbm [shape: f32[3], index: 3, kind: input, shape index: {}]   ;;  %s3407_s4 = inlined_call_operand.hbm [shape: f32[3,1536], index: 4, kind: input, shape index: {}]   ;;  %s3408_s5 = inlined_call_operand.vmem [shape: f32[1,1536], index: 5, kind: input, shape index: {}]   ;;  %s3409_s6 = inlined_call_operand.hbm [shape: f32[1,1536], index: 6, kind: input, shape index: {}]   ;;  %s3410_s7 = inlined_call_operand.hbm [shape: f32[4,512], index: 7, kind: input, shape index: {}]   ;;  %s3411_s8 = inlined_call_operand.hbm [shape: f32[1,512], index: 8, kind: input, shape index: {}]   ;;  %s3412_s9 = inlined_call_operand.hbm [shape: bf16[512,256], index: 9, kind: input, shape index: {}]   ;;  %s3413_s10 = inlined_call_operand.hbm [shape: f32[1,256], index: 10, kind: input, shape index: {}]   ;;  %s3414_s11 = inlined_call_operand.hbm [shape: f32[1,256], index: 11, kind: input, shape index: {}]   ;;  %s3415_s12 = inlined_call_operand.<no memory space> [shape: f32[1], index: 12, kind: input, shape index: {}]   ;;  %s3416_s13 = inlined_call_operand.vmem [shape: f32[2,1], index: 13, kind: output, shape index: {}]  }
   0x1   :  { %20 = vsyncpa [#allocation6], 0 }
   0x2   :  { %21 = vsyncpa [#allocation5], 0 }
   0x3   :  { %22 = vsyncpa [#allocation11], 0 }
   0x4   :  { %23 = vsyncpa [#allocation14], 0 }
   0x5   :  { %24 = vsyncpa [#allocation17], 0  ;;  %s2464_s25 = smov [#allocation10]   ;;  %s2465_s27 = smov [#allocation13]  }
   0x6   :  { %s65_s26 = sshll.u32 %s2464_s25, 4  ;;  %s85_s28 = sshll.u32 %s2465_s27, 4  ;;  %s66_s26 = int_to_ptr.vmem [resolvable:$true] %s65_s26  ;;  %s86_s28 = int_to_ptr.vmem [resolvable:$true] %s85_s28 }
   0x7   :  { %s2276_s14 = scalar_lea.hbm %s3409_s6, 192 }
   0x8   :  { %p2277_p0 = scmp.ne.s32.totalorder %s3409_s6, %s2276_s14  ;;  %p2280_p1 = scmp.lt.u32.totalorder %s2276_s14, %s3409_s6 }
   0xa   :  { %p2282_p2 = pnand %p2280_p1, %p2277_p0 }
   0xc   :  { %2285 = shalt.err (!%p2282_p2)
}
   0xd   :  { %s2286_s19 = scalar_lea.vmem %s66_s26, 192  ;;  %p2291_p4 = scmp.lt.s32.totalorder %s66_s26, %s66_s26 }
   0xe   :  { %p2287_p3 = scmp.ne.s32.totalorder %s66_s26, %s2286_s19  ;;  %p2292_p5 = scmp.lt.s32.totalorder %s2286_s19, %s2286_s19 }
  0x10   :  { %p2293_p6 = por %p2292_p5, %p2291_p4 }
  0x12   :  { %p2294_p7 = pnand %p2293_p6, %p2287_p3 }
  0x14   :  { %2297 = shalt.err (!%p2294_p7)
}
  0x15   :  { %68 = dma.hbm_to_vmem [thread:$0]  %s3409_s6, 192, %s66_s26, [#allocation11]  }
  0x16   :  { %s2298_s24 = scalar_lea.hbm %s3411_s8, 64 }
  0x17   :  { %p2299_p8 = scmp.ne.s32.totalorder %s3411_s8, %s2298_s24  ;;  %p2302_p9 = scmp.lt.u32.totalorder %s2298_s24, %s3411_s8 }
  0x19   :  { %p2304_p10 = pnand %p2302_p9, %p2299_p8 }
  0x1b   :  { %2307 = shalt.err (!%p2304_p10)
}
  0x1c   :  { %s2308_s14 = scalar_lea.vmem %s86_s28, 64  ;;  %p2313_p12 = scmp.lt.s32.totalorder %s86_s28, %s86_s28 }
  0x1d   :  { %p2309_p11 = scmp.ne.s32.totalorder %s86_s28, %s2308_s14  ;;  %p2314_p13 = scmp.lt.s32.totalorder %s2308_s14, %s2308_s14 }
  0x1f   :  { %p2315_p0 = por %p2314_p13, %p2313_p12 }
  0x21   :  { %p2316_p1 = pnand %p2315_p0, %p2309_p11 }
  0x23   :  { %2319 = shalt.err (!%p2316_p1)
}
  0x24   :  { %88 = dma.hbm_to_vmem [thread:$0]  %s3411_s8, 64, %s86_s28, [#allocation14]  }
  0x25   :  { %s35_s17 = sshll.u32 %s3405_s2, 4  ;;  %s2466_s18 = smov [#allocation16]   ;;  %s36_s17 = int_to_ptr.vmem [resolvable:$true] %s35_s17 }
  0x26   :  { %s107_s19 = sshll.u32 %s2466_s18, 4  ;;  %s2320_s22 = scalar_lea.hbm %s3413_s10, 32  ;;  %s108_s19 = int_to_ptr.vmem [resolvable:$true] %s107_s19 }
  0x27   :  { %p2321_p2 = scmp.ne.s32.totalorder %s3413_s10, %s2320_s22  ;;  %p2324_p3 = scmp.lt.u32.totalorder %s2320_s22, %s3413_s10 }
  0x29   :  { %p2326_p4 = pnand %p2324_p3, %p2321_p2 }
  0x2b   :  { %2329 = shalt.err (!%p2326_p4)
}
  0x2c   :  { %s2330_s8 = scalar_lea.vmem %s108_s19, 32  ;;  %p2335_p6 = scmp.lt.s32.totalorder %s108_s19, %s108_s19 }
  0x2d   :  { %p2331_p5 = scmp.ne.s32.totalorder %s108_s19, %s2330_s8  ;;  %p2336_p7 = scmp.lt.s32.totalorder %s2330_s8, %s2330_s8 }
  0x2f   :  { %p2337_p8 = por %p2336_p7, %p2335_p6 }
  0x31   :  { %p2338_p9 = pnand %p2337_p8, %p2331_p5 }
  0x33   :  { %2341 = shalt.err (!%p2338_p9)
}
  0x34   :  { %110 = dma.hbm_to_vmem [thread:$0]  %s3413_s10, 32, %s108_s19, [#allocation17]  }
  0x35   :  { %s2342_s29 = scalar_lea.vmem %s36_s17, 16  ;;  %p2347_p11 = scmp.lt.s32.totalorder %s36_s17, %s36_s17 }
  0x36   :  { %p2343_p10 = scmp.ne.s32.totalorder %s36_s17, %s2342_s29  ;;  %p2348_p12 = scmp.lt.s32.totalorder %s2342_s29, %s2342_s29 }
  0x38   :  { %p2349_p13 = por %p2348_p12, %p2347_p11 }
  0x3a   :  { %p2350_p0 = pnand %p2349_p13, %p2343_p10 }
  0x3c   :  { %2353 = shalt.err (!%p2350_p0)
}
  0x3d   :  { %s2467_s30 = smov [#allocation4]   ;;  %s2354_s26 = scalar_lea.hbm %s3406_s3, 16 }
  0x3e   :  { %38 = dma.vmem_to_smem %s36_s17, 16, %s2467_s30, [#allocation7]  }
  0x3f   :  { %p2355_p1 = scmp.ne.s32.totalorder %s3406_s3, %s2354_s26  ;;  %p2358_p2 = scmp.lt.u32.totalorder %s2354_s26, %s3406_s3 }
  0x41   :  { %p2360_p3 = pnand %p2358_p2, %p2355_p1 }
  0x43   :  { %2363 = shalt.err (!%p2360_p3)
}
  0x44   :  { %s2468_s10 = smov [#allocation8]   ;;  %s2469_s17 = smov [#allocation9]  }
  0x45   :  { %46 = dma.hbm_to_smem %s3406_s3, 16, %s2468_s10, [#allocation6]  }
  0x46   :  { %s53_s22 = sshll.u32 %s2469_s17, 4  ;;  %s2470_s23 = smov [#allocation12]   ;;  %s54_s22 = int_to_ptr.vmem [resolvable:$true] %s53_s22 }
  0x47   :  { %s75_s24 = sshll.u32 %s2470_s23, 4  ;;  %s2364_s8 = scalar_lea.hbm %s3407_s4, 768  ;;  %s76_s24 = int_to_ptr.vmem [resolvable:$true] %s75_s24 }
  0x48   :  { %p2365_p4 = scmp.ne.s32.totalorder %s3407_s4, %s2364_s8  ;;  %p2368_p5 = scmp.lt.u32.totalorder %s2364_s8, %s3407_s4 }
  0x4a   :  { %p2370_p6 = pnand %p2368_p5, %p2365_p4 }
  0x4c   :  { %2373 = shalt.err (!%p2370_p6)
}
  0x4d   :  { %s2374_s3 = scalar_lea.vmem %s54_s22, 768  ;;  %p2379_p8 = scmp.lt.s32.totalorder %s54_s22, %s54_s22 }
  0x4e   :  { %p2375_p7 = scmp.ne.s32.totalorder %s54_s22, %s2374_s3  ;;  %p2380_p9 = scmp.lt.s32.totalorder %s2374_s3, %s2374_s3 }
  0x50   :  { %p2381_p10 = por %p2380_p9, %p2379_p8 }
  0x52   :  { %p2382_p11 = pnand %p2381_p10, %p2375_p7 }
  0x54   :  { %2385 = shalt.err (!%p2382_p11)
}
  0x55   :  { %56 = dma.hbm_to_vmem [thread:$0]  %s3407_s4, 768, %s54_s22, [#allocation5]  }
  0x56   :  { %s2386_s16 = scalar_lea.hbm %s3410_s7, 256 }
  0x57   :  { %p2387_p12 = scmp.ne.s32.totalorder %s3410_s7, %s2386_s16  ;;  %p2390_p13 = scmp.lt.u32.totalorder %s2386_s16, %s3410_s7 }
  0x59   :  { %p2392_p0 = pnand %p2390_p13, %p2387_p12 }
  0x5b   :  { %2395 = shalt.err (!%p2392_p0)
}
  0x5c   :  { %s2396_s21 = scalar_lea.vmem %s76_s24, 256  ;;  %p2401_p2 = scmp.lt.s32.totalorder %s76_s24, %s76_s24 }
  0x5d   :  { %p2397_p1 = scmp.ne.s32.totalorder %s76_s24, %s2396_s21  ;;  %p2402_p3 = scmp.lt.s32.totalorder %s2396_s21, %s2396_s21 }
  0x5f   :  { %p2403_p4 = por %p2402_p3, %p2401_p2 }
  0x61   :  { %p2404_p5 = pnand %p2403_p4, %p2397_p1 }
  0x63   :  { %2407 = shalt.err (!%p2404_p5)
}
  0x64   :  { %78 = dma.hbm_to_vmem [thread:$0]  %s3410_s7, 256, %s76_s24, [#allocation11]  }
  0x65   :  { %s2471_s22 = smov [#allocation15]   ;;  %s2408_s8 = scalar_lea.hbm %s3412_s9, 8192 }
  0x66   :  { %s94_s23 = sshll.u32 %s2471_s22, 4  ;;  %p2409_p6 = scmp.ne.s32.totalorder %s3412_s9, %s2408_s8  ;;  %s95_s23 = int_to_ptr.vmem [resolvable:$true] %s94_s23 }
  0x67   :  { %p2412_p7 = scmp.lt.u32.totalorder %s2408_s8, %s3412_s9 }
  0x69   :  { %p2414_p8 = pnand %p2412_p7, %p2409_p6 }
  0x6b   :  { %2417 = shalt.err (!%p2414_p8)
}
  0x6c   :  { %s2418_s3 = scalar_lea.vmem %s95_s23, 8192  ;;  %p2423_p10 = scmp.lt.s32.totalorder %s95_s23, %s95_s23 }
  0x6d   :  { %p2419_p9 = scmp.ne.s32.totalorder %s95_s23, %s2418_s3  ;;  %p2424_p11 = scmp.lt.s32.totalorder %s2418_s3, %s2418_s3 }
  0x6f   :  { %p2425_p12 = por %p2424_p11, %p2423_p10 }
  0x71   :  { %p2426_p13 = pnand %p2425_p12, %p2419_p9 }
  0x73   :  { %2429 = shalt.err (!%p2426_p13)
}
  0x74   :  { %s2472_s7 = smov 128   ;;  %s2473_s24 = smov 8  }
  0x75   :  { %100 = dma.hbm_to_vmem [thread:$0]  %s3412_s9, 8192, %s95_s23, [#allocation14], %s2472_s7, %s2472_s7, %s2473_s24  }
  0x76   :  { %s2474_s26 = smov [#allocation18]   ;;  %s2430_s20 = scalar_lea.hbm %s3414_s11, 32 }
  0x77   :  { %s117_s15 = sshll.u32 %s2474_s26, 4  ;;  %p2431_p0 = scmp.ne.s32.totalorder %s3414_s11, %s2430_s20  ;;  %s118_s15 = int_to_ptr.vmem [resolvable:$true] %s117_s15 }
  0x78   :  { %p2434_p1 = scmp.lt.u32.totalorder %s2430_s20, %s3414_s11 }
  0x7a   :  { %p2436_p2 = pnand %p2434_p1, %p2431_p0 }
  0x7c   :  { %2439 = shalt.err (!%p2436_p2)
}
  0x7d   :  { %s2440_s17 = scalar_lea.vmem %s118_s15, 32  ;;  %p2445_p4 = scmp.lt.s32.totalorder %s118_s15, %s118_s15 }
  0x7e   :  { %p2441_p3 = scmp.ne.s32.totalorder %s118_s15, %s2440_s17  ;;  %p2446_p5 = scmp.lt.s32.totalorder %s2440_s17, %s2440_s17 }
  0x80   :  { %p2447_p6 = por %p2446_p5, %p2445_p4 }
  0x82   :  { %p2448_p7 = pnand %p2447_p6, %p2441_p3 }
  0x84   :  { %2451 = shalt.err (!%p2448_p7)
}
  0x85   :  { %120 = dma.hbm_to_vmem [thread:$0]  %s3414_s11, 32, %s118_s15, [#allocation17]  }
  0x86   :  { %2452 = dma.done.wait [#allocation7], 16  }
  0x87   :  { %2453 = vsyncadd [#allocation7], 4294967280 }
  0x88   :  { %2454 = dma.done.wait [#allocation6], 16  }
  0x89   :  { %2455 = vsyncadd [#allocation6], 4294967280 }
  0x8a   :  { %2456 = dma.done.wait [#allocation5], 768  }
  0x8b   :  { %2457 = vsyncadd [#allocation5], 4294966528 }
  0x8c   :  { %2458 = dma.done.wait [#allocation11], 448  }
  0x8d   :  { %2459 = vsyncadd [#allocation11], 4294966848 }
  0x8e   :  { %2460 = dma.done.wait [#allocation14], 8256  }
  0x8f   :  { %2461 = vsyncadd [#allocation14], 4294959040 }
  0x90   :  { %2462 = dma.done.wait [#allocation17], 64  }
  0x91   :  { %2463 = vsyncadd [#allocation17], 4294967232 }
  0x92   :  { %150 = sfence }
  0x93   :  { %v161_v0 = vld [vmem:[%s3403_s0 + $0x10] sm:$0xff]  ;;  %v159_v1 = vld [vmem:[%s3403_s0] sm:$0xff]  ;;  %s2475_s11 = smov 1   ;;  %v162_v2 = vld [vmem:[%s3403_s0 + $0x18] sm:$0xff]  ;;  %v2476_v4 = vmov 1   ;;  %v2477_v5 = vmov 0  }
  0x94   :  { %171 = vrot.lane.b32.xlu1 %v161_v0, %s2475_s11  ;;  %167 = vrot.lane.b32.xlu0 %v159_v1, %s2475_s11  ;;  %v160_v3 = vld [vmem:[%s3403_s0 + $0x8] sm:$0xff]  ;;  %vm151_vm0 = vcmask 146432   ;;  %vm154_vm1 = vcmask 140288   ;;  %v2478_v6 = vmov 0.0   ;;  %v1373_v7 = vld [vmem:[%s3404_s1] sm:$0x3] }
  0x95   :  { %2177 = vset.pattern.permute.xlu1 %v2476_v4  ;;  %2176 = vset.pattern.permute.xlu0 %v2477_v5  ;;  %156 = vst.msk [vmem:[#allocation2 + $0x18] sm:$0xff] %vm151_vm0, %v2478_v6  ;;  %157 = vst.msk [vmem:[#allocation2 + $0x20] sm:$0xff] %vm151_vm0, %v2478_v6  ;;  %v2479_v8 = vmov 2   ;;  %v2480_v9 = vmov 3   ;;  %v2180_v10 = vld [vmem:[#allocation15 + $0x4] ss:$8 sps:$4 sm:$0xff]  }
  0x96   :  { %152 = vst.msk [vmem:[#allocation2] sm:$0xff] %vm151_vm0, %v2478_v6  ;;  %153 = vst.msk [vmem:[#allocation2 + $0x8] sm:$0xff] %vm151_vm0, %v2478_v6  ;;  %v2182_v11 = vld [vmem:[#allocation15 + $0x104] ss:$8 sps:$4 sm:$0xff]   ;;  %v2184_v12 = vld [vmem:[#allocation15] ss:$8 sps:$4 sm:$0xff]   ;;  %1940 = vmatprep.subr.bf16.mxu1 %v2180_v10 }
  0x97   :  { %158 = vst.msk [vmem:[#allocation2 + $0x28] sm:$0x3] %vm154_vm1, %v2478_v6  ;;  %155 = vst.msk [vmem:[#allocation2 + $0x10] sm:$0x3] %vm154_vm1, %v2478_v6  ;;  %v2185_v13 = vld [vmem:[#allocation15 + $0x100] ss:$8 sps:$4 sm:$0xff]   ;;  %1981 = vmatprep.subr.bf16.mxu0 %v2182_v11  ;;  %1941 = vmatpush1.bf16.msra.mxu1 %v2184_v12 }
  0x98   :  { %173 = vrot.lane.b32.xlu1 %v162_v2, %s2475_s11  ;;  %169 = vrot.lane.b32.xlu0 %v160_v3, %s2475_s11  ;;  %v2186_v14 = vld [vmem:[#allocation15 + $0x14] ss:$8 sps:$4 sm:$0xff]   ;;  %v2190_v16 = vld [vmem:[#allocation15 + $0x10] ss:$8 sps:$4 sm:$0xff]   ;;  %v2192_v18 = vld [vmem:[#allocation15 + $0x24] ss:$8 sps:$4 sm:$0xff]  }
  0x99   :  { %1982 = vmatpush1.bf16.msra.mxu0 %v2185_v13  ;;  %v2188_v15 = vld [vmem:[#allocation15 + $0x114] ss:$8 sps:$4 sm:$0xff]   ;;  %v2191_v17 = vld [vmem:[#allocation15 + $0x110] ss:$8 sps:$4 sm:$0xff]   ;;  %1942 = vmatprep.subr.bf16.mxu1 %v2186_v14  ;;  %v2194_v19 = vld [vmem:[#allocation15 + $0x124] ss:$8 sps:$4 sm:$0xff]  }
  0x9a   :  { %1983 = vmatprep.subr.bf16.mxu0 %v2188_v15  ;;  %v2196_v20 = vld [vmem:[#allocation15 + $0x20] ss:$8 sps:$4 sm:$0xff]   ;;  %v2198_v22 = vld [vmem:[#allocation15 + $0x34] ss:$8 sps:$4 sm:$0xff]   ;;  %v2202_v24 = vld [vmem:[#allocation15 + $0x30] ss:$8 sps:$4 sm:$0xff]  }
  0x9b   :  { %1943 = vmatpush1.bf16.msra.mxu1 %v2190_v16  ;;  %v2197_v21 = vld [vmem:[#allocation15 + $0x120] ss:$8 sps:$4 sm:$0xff]   ;;  %v2200_v23 = vld [vmem:[#allocation15 + $0x134] ss:$8 sps:$4 sm:$0xff]   ;;  %v2203_v25 = vld [vmem:[#allocation15 + $0x130] ss:$8 sps:$4 sm:$0xff]   ;;  %v184_v16 = vlaneseq }
  0x9c   :  { %1408 = vperm.xlu1 %2177, %v1373_v7   ;;  %1377 = vperm.xlu0 %2176, %v1373_v7   ;;  %v2204_v26 = vld [vmem:[#allocation15 + $0x44] ss:$8 sps:$4 sm:$0xff]   ;;  %v2208_v28 = vld [vmem:[#allocation15 + $0x40] ss:$8 sps:$4 sm:$0xff]   ;;  %v2210_v30 = vld [vmem:[#allocation15 + $0x54] ss:$8 sps:$4 sm:$0xff]  }
  0x9d   :  { %1984 = vmatpush1.bf16.msra.mxu0 %v2191_v17  ;;  %1944 = vmatprep.subr.bf16.mxu1 %v2192_v18  ;;  %v2206_v27 = vld [vmem:[#allocation15 + $0x144] ss:$8 sps:$4 sm:$0xff]   ;;  %v2209_v29 = vld [vmem:[#allocation15 + $0x140] ss:$8 sps:$4 sm:$0xff]   ;;  %v2212_v31 = vld [vmem:[#allocation15 + $0x154] ss:$8 sps:$4 sm:$0xff]  }
  0x9e   :  { %1985 = vmatprep.subr.bf16.mxu0 %v2194_v19  ;;  %v2214_v32 = vld [vmem:[#allocation15 + $0x50] ss:$8 sps:$4 sm:$0xff]   ;;  %v2216_v34 = vld [vmem:[#allocation15 + $0x64] ss:$8 sps:$4 sm:$0xff]   ;;  %v2220_v36 = vld [vmem:[#allocation15 + $0x60] ss:$8 sps:$4 sm:$0xff]  }
  0x9f   :  { %1945 = vmatpush1.bf16.msra.mxu1 %v2196_v20  ;;  %v2215_v33 = vld [vmem:[#allocation15 + $0x150] ss:$8 sps:$4 sm:$0xff]   ;;  %v2218_v35 = vld [vmem:[#allocation15 + $0x164] ss:$8 sps:$4 sm:$0xff]   ;;  %v2221_v37 = vld [vmem:[#allocation15 + $0x160] ss:$8 sps:$4 sm:$0xff]  }
  0xa0   :  { %2178 = vset.pattern.permute.xlu1 %v2479_v8  ;;  %2179 = vset.pattern.permute.xlu0 %v2480_v9  ;;  %v2222_v38 = vld [vmem:[#allocation15 + $0x74] ss:$8 sps:$4 sm:$0xff]   ;;  %v2226_v40 = vld [vmem:[#allocation15 + $0x70] ss:$8 sps:$4 sm:$0xff]   ;;  %v2228_v42 = vld [vmem:[#allocation15 + $0x84] ss:$8 sps:$4 sm:$0xff]  }
  0xa1   :  { %1443 = vperm.xlu1 %2178, %v1373_v7   ;;  %1478 = vperm.xlu0 %2179, %v1373_v7   ;;  %v2224_v39 = vld [vmem:[#allocation15 + $0x174] ss:$8 sps:$4 sm:$0xff]   ;;  %v2227_v41 = vld [vmem:[#allocation15 + $0x170] ss:$8 sps:$4 sm:$0xff]   ;;  %v2230_v43 = vld [vmem:[#allocation15 + $0x184] ss:$8 sps:$4 sm:$0xff]  }
  0xa2   :  { %1986 = vmatpush1.bf16.msra.mxu0 %v2197_v21  ;;  %1946 = vmatprep.subr.bf16.mxu1 %v2198_v22  ;;  %v2232_v44 = vld [vmem:[#allocation15 + $0x80] ss:$8 sps:$4 sm:$0xff]   ;;  %v2234_v46 = vld [vmem:[#allocation15 + $0x94] ss:$8 sps:$4 sm:$0xff]   ;;  %v2238_v48 = vld [vmem:[#allocation15 + $0x90] ss:$8 sps:$4 sm:$0xff]  }
  0xa3   :  { %1987 = vmatprep.subr.bf16.mxu0 %v2200_v23  ;;  %1947 = vmatpush1.bf16.msra.mxu1 %v2202_v24  ;;  %v2233_v45 = vld [vmem:[#allocation15 + $0x180] ss:$8 sps:$4 sm:$0xff]   ;;  %v2236_v47 = vld [vmem:[#allocation15 + $0x194] ss:$8 sps:$4 sm:$0xff]   ;;  %v2239_v49 = vld [vmem:[#allocation15 + $0x190] ss:$8 sps:$4 sm:$0xff]  }
  0xa4   :  { %1948 = vmatprep.subr.bf16.mxu1 %v2204_v26  ;;  %v2240_v50 = vld [vmem:[#allocation15 + $0xa4] ss:$8 sps:$4 sm:$0xff]   ;;  %v2244_v52 = vld [vmem:[#allocation15 + $0xa0] ss:$8 sps:$4 sm:$0xff]   ;;  %v2246_v54 = vld [vmem:[#allocation15 + $0xb4] ss:$8 sps:$4 sm:$0xff]  }
  0xa5   :  { %v2242_v51 = vld [vmem:[#allocation15 + $0x1a4] ss:$8 sps:$4 sm:$0xff]   ;;  %v2245_v53 = vld [vmem:[#allocation15 + $0x1a0] ss:$8 sps:$4 sm:$0xff]   ;;  %v2248_v55 = vld [vmem:[#allocation15 + $0x1b4] ss:$8 sps:$4 sm:$0xff]  }
  0xa6   :  { %1988 = vmatpush1.bf16.msra.mxu0 %v2203_v25  ;;  %v2250_v56 = vld [vmem:[#allocation15 + $0xb0] ss:$8 sps:$4 sm:$0xff]   ;;  %v2252_v58 = vld [vmem:[#allocation15 + $0xc4] ss:$8 sps:$4 sm:$0xff]   ;;  %v2256_v60 = vld [vmem:[#allocation15 + $0xc0] ss:$8 sps:$4 sm:$0xff]  }
  0xa7   :  { %1989 = vmatprep.subr.bf16.mxu0 %v2206_v27  ;;  %1949 = vmatpush1.bf16.msra.mxu1 %v2208_v28  ;;  %v2251_v57 = vld [vmem:[#allocation15 + $0x1b0] ss:$8 sps:$4 sm:$0xff]   ;;  %v2254_v59 = vld [vmem:[#allocation15 + $0x1c4] ss:$8 sps:$4 sm:$0xff]   ;;  %v2257_v61 = vld [vmem:[#allocation15 + $0x1c0] ss:$8 sps:$4 sm:$0xff]  }
  0xa8   :  { %1950 = vmatprep.subr.bf16.mxu1 %v2210_v30  ;;  %v2258_v62 = vld [vmem:[#allocation15 + $0xd4] ss:$8 sps:$4 sm:$0xff]   ;;  %v2262_v0 = vld [vmem:[#allocation15 + $0xd0] ss:$8 sps:$4 sm:$0xff]   ;;  %v2264_v2 = vld [vmem:[#allocation15 + $0xe4] ss:$8 sps:$4 sm:$0xff]  }
  0xa9   :  { %v2260_v63 = vld [vmem:[#allocation15 + $0x1d4] ss:$8 sps:$4 sm:$0xff]   ;;  %v2263_v1 = vld [vmem:[#allocation15 + $0x1d0] ss:$8 sps:$4 sm:$0xff]   ;;  %v2266_v3 = vld [vmem:[#allocation15 + $0x1e4] ss:$8 sps:$4 sm:$0xff]  }
  0xaa   :  { %1990 = vmatpush1.bf16.msra.mxu0 %v2209_v29  ;;  %v2268_v4 = vld [vmem:[#allocation15 + $0xe0] ss:$8 sps:$4 sm:$0xff]   ;;  %v2270_v7 = vld [vmem:[#allocation15 + $0xf4] ss:$8 sps:$4 sm:$0xff]   ;;  %v2274_v9 = vld [vmem:[#allocation15 + $0xf0] ss:$8 sps:$4 sm:$0xff]  }
  0xab   :  { %1991 = vmatprep.subr.bf16.mxu0 %v2212_v31  ;;  %1951 = vmatpush1.bf16.msra.mxu1 %v2214_v32  ;;  %v2269_v5 = vld [vmem:[#allocation15 + $0x1e0] ss:$8 sps:$4 sm:$0xff]   ;;  %v2272_v8 = vld [vmem:[#allocation15 + $0x1f4] ss:$8 sps:$4 sm:$0xff]   ;;  %v2275_v10 = vld [vmem:[#allocation15 + $0x1f0] ss:$8 sps:$4 sm:$0xff]  }
  0xac   :  { %1952 = vmatprep.subr.bf16.mxu1 %v2216_v34  ;;  %vm179_vm2 = vcmask 138248   ;;  %s2063_s1 = sld [smem:[#allocation4 + $0x1]]  ;;  %s2064_s7 = sld [smem:[#allocation4 + $0xa]]  ;;  %v2680_v22 = vshrl.u32 %v184_v16, 7  ;;  %vm773_vm6 = vcmask 130048   ;;  %vm1347_vm9 = vcmask 1041408  }
  0xad   :  { %s2065_s24 = sld [smem:[#allocation4 + $0x13]]  ;;  %s2481_s14 = smov 127   ;;  %v1406_v31 = vld [vmem:[#allocation12 + $0x1] ss:$4 sm:$0xf]  ;;  %vm799_vm10 = vcmask 130112  }
  0xae   :  { %1992 = vmatpush1.bf16.msra.mxu0 %v2215_v33  ;;  %s2690_s6 = sld [smem:[#allocation4 + $0x2]]  ;;  %v2693_v27 = vsub.s32 0, %v2680_v22  ;;  %v2696_v28 = vsub.s32 2, %v2680_v22  ;;  %v2701_v29 = vsub.s32 1, %v2680_v22  ;;  %v2704_v30 = vsub.s32 3, %v2680_v22  ;;  %s2743_s26 = sld [smem:[#allocation4 + $0xb]] }
  0xaf   :  { %1993 = vmatprep.subr.bf16.mxu0 %v2218_v35  ;;  %1953 = vmatpush1.bf16.msra.mxu1 %v2220_v36  ;;  %v1374_v34 = vld [vmem:[#allocation12] ss:$4 sm:$0xf]  ;;  %s2482_s15 = smov 126   ;;  %s2068_s16 = sld [smem:[#allocation4 + $0x14]]  ;;  %vm810_vm11 = vcmask 1041409  }
  0xb0   :  { %1954 = vmatprep.subr.bf16.mxu1 %v2222_v38  ;;  %v1415_v36 = vrot.slane %v1406_v31, %v2693_v27  ;;  %v1441_v38 = vld [vmem:[#allocation12 + $0x2] ss:$4 sm:$0xf]  ;;  %s2072_s18 = sld [smem:[#allocation4 + $0x4]]  ;;  %s2073_s20 = sld [smem:[#allocation4 + $0xd]]  ;;  %vm813_vm12 = vcmask 123904  }
  0xb1   :  { %s2074_s10 = sld [smem:[#allocation4 + $0x16]]  ;;  %s2075_s19 = sld [smem:[#allocation4 + $0x5]]  ;;  %vm2047_vm13 = vcmask 1024  }
  0xb2   :  { %1994 = vmatpush1.bf16.msra.mxu0 %v2221_v37  ;;  %v224_v15 = vstv %s2063_s1  ;;  %v250_v21 = vstv %s2064_s7  ;;  %v1423_v37 = vrot.slane %v1406_v31, %v2696_v28  ;;  %s2076_s21 = sld [smem:[#allocation4 + $0xe]]  ;;  %s2077_s4 = sld [smem:[#allocation4 + $0x17]] }
  0xb3   :  { %1995 = vmatprep.subr.bf16.mxu0 %v2224_v39  ;;  %1955 = vmatpush1.bf16.msra.mxu1 %v2226_v40  ;;  %v2708_v35 = vstv %s2065_s24  ;;  %v1419_v39 = vrot.slane %v1406_v31, %v2701_v29  ;;  %v1427_v40 = vrot.slane %v1406_v31, %v2704_v30  ;;  %s2081_s17 = sld [smem:[#allocation4 + $0x7]]  ;;  %s2082_s9 = sld [smem:[#allocation4 + $0x10]] }
  0xb4   :  { %1956 = vmatprep.subr.bf16.mxu1 %v2228_v42  ;;  %v1388_v42 = vrot.slane %v1374_v34, %v2701_v29  ;;  %s2083_s22 = sld [smem:[#allocation4 + $0x19]]  ;;  %s205_s23 = sld [smem:[#allocation4]] }
  0xb5   :  { %s2084_s25 = sld [smem:[#allocation4 + $0x8]]  ;;  %s2061_s27 = sld [smem:[#allocation4 + $0x9]] }
  0xb6   :  { %1996 = vmatpush1.bf16.msra.mxu0 %v2227_v41  ;;  %v1384_v41 = vrot.slane %v1374_v34, %v2693_v27  ;;  %s2085_s8 = sld [smem:[#allocation4 + $0x11]]  ;;  %s2062_s11 = sld [smem:[#allocation4 + $0x12]] }
  0xb7   :  { %1997 = vmatprep.subr.bf16.mxu0 %v2230_v43  ;;  %1957 = vmatpush1.bf16.msra.mxu1 %v2232_v44  ;;  %v1392_v43 = vrot.slane %v1374_v34, %v2696_v28  ;;  %v1396_v44 = vrot.slane %v1374_v34, %v2704_v30  ;;  %s2086_s2 = sld [smem:[#allocation4 + $0x1a]]  ;;  %s2069_s28 = sld [smem:[#allocation4 + $0x3]] }
  0xb8   :  { %1958 = vmatprep.subr.bf16.mxu1 %v2234_v46  ;;  %s2070_s29 = sld [smem:[#allocation4 + $0xc]]  ;;  %s2071_s30 = sld [smem:[#allocation4 + $0x15]] }
  0xb9   :  { %s2078_s0 = sld [smem:[#allocation4 + $0x6]]  ;;  %s2079_s3 = sld [smem:[#allocation4 + $0xf]] }
  0xba   :  { %1998 = vmatpush1.bf16.msra.mxu0 %v2233_v45  ;;  %v1476_v45 = vld [vmem:[#allocation12 + $0x3] ss:$4 sm:$0xf]  ;;  %s2080_s1 = sld [smem:[#allocation4 + $0x18]]  ;;  %s2087_s24 = sld [smem:[#allocation8 + $0x1]] }
  0xbb   :  { %1999 = vmatprep.subr.bf16.mxu0 %v2236_v47  ;;  %1959 = vmatpush1.bf16.msra.mxu1 %v2238_v48  ;;  %s759_s7 = sld [smem:[#allocation8]] }
  0xbc   :  { %1960 = vmatprep.subr.bf16.mxu1 %v2240_v50  ;;  %v1450_v50 = vrot.slane %v1441_v38, %v2693_v27 }
  0xbe   :  { %2000 = vmatpush1.bf16.msra.mxu0 %v2239_v49 }
  0xbf   :  { %2001 = vmatprep.subr.bf16.mxu0 %v2242_v51  ;;  %1961 = vmatpush1.bf16.msra.mxu1 %v2244_v52  ;;  %v1454_v51 = vrot.slane %v1441_v38, %v2701_v29  ;;  %v2725_v52 = vld [vmem:[#allocation13] sm:$0xf] }
  0xc0   :  { %1962 = vmatprep.subr.bf16.mxu1 %v2246_v54 }
  0xc2   :  { %2002 = vmatpush1.bf16.msra.mxu0 %v2245_v53 }
  0xc3   :  { %2003 = vmatprep.subr.bf16.mxu0 %v2248_v55  ;;  %1963 = vmatpush1.bf16.msra.mxu1 %v2250_v56  ;;  %v1458_v55 = vrot.slane %v1441_v38, %v2696_v28  ;;  %v1462_v56 = vrot.slane %v1441_v38, %v2704_v30 }
  0xc4   :  { %1964 = vmatprep.subr.bf16.mxu1 %v2252_v58  ;;  %v1485_v58 = vrot.slane %v1476_v45, %v2693_v27 }
  0xc6   :  { %2004 = vmatpush1.bf16.msra.mxu0 %v2251_v57  ;;  %v2732_v57 = vstv %s2690_s6 }
  0xc7   :  { %2005 = vmatprep.subr.bf16.mxu0 %v2254_v59  ;;  %1965 = vmatpush1.bf16.msra.mxu1 %v2256_v60  ;;  %v1493_v59 = vrot.slane %v1476_v45, %v2696_v28  ;;  %v1489_v60 = vrot.slane %v1476_v45, %v2701_v29 }
  0xc8   :  { %1966 = vmatprep.subr.bf16.mxu1 %v2258_v62 }
  0xca   :  { %2006 = vmatpush1.bf16.msra.mxu0 %v2257_v61 }
  0xcb   :  { %2007 = vmatprep.subr.bf16.mxu0 %v2260_v63  ;;  %1967 = vmatpush1.bf16.msra.mxu1 %v2262_v0  ;;  %v1497_v63 = vrot.slane %v1476_v45, %v2704_v30  ;;  %v1515_v0 = vrot.slane %v2725_v52, %v2693_v27 }
  0xcc   :  { %1968 = vmatprep.subr.bf16.mxu1 %v2264_v2 }
  0xce   :  { %2008 = vmatpush1.bf16.msra.mxu0 %v2263_v1 }
  0xcf   :  { %2009 = vmatprep.subr.bf16.mxu0 %v2266_v3  ;;  %1969 = vmatpush1.bf16.msra.mxu1 %v2268_v4 }
  0xd0   :  { %1970 = vmatprep.subr.bf16.mxu1 %v2270_v7 }
  0xd2   :  { %2010 = vmatpush1.bf16.msra.mxu0 %v2269_v5 }
  0xd3   :  { %2011 = vmatprep.subr.bf16.mxu0 %v2272_v8  ;;  %1971 = vmatpush1.bf16.msra.mxu1 %v2274_v9 }
  0xd6   :  { %2012 = vmatpush1.bf16.msra.mxu0 %v2275_v10 }
 0x106   :  { %v172_v11 = vpop.permute.xlu1 %171  ;;  %v168_v12 = vpop.permute.xlu0 %167 }
 0x107   :  { %182 = vst.msk [vmem:[#allocation2 + $0x19] sm:$0xff] %vm179_vm2, %v172_v11  ;;  %180 = vst.msk [vmem:[#allocation2 + $0x1] sm:$0xff] %vm179_vm2, %v168_v12 }
 0x10a   :  { %v174_v13 = vpop.permute.xlu1 %173  ;;  %v170_v14 = vpop.permute.xlu0 %169 }
 0x10b   :  { %183 = vst.msk [vmem:[#allocation2 + $0x21] sm:$0xff] %vm179_vm2, %v174_v13  ;;  %181 = vst.msk [vmem:[#allocation2 + $0x9] sm:$0xff] %vm179_vm2, %v170_v14 }
 0x10e   :  { %v2673_v17 = vld [vmem:[#allocation2 + $0x18] sm:$0xff]  ;;  %v2675_v18 = vld [vmem:[#allocation2] sm:$0xff] }
 0x10f   :  { %v227_v19 = vmul.f32 %v224_v15, %v2673_v17  ;;  %v225_v20 = vmul.f32 %v224_v15, %v2675_v18  ;;  %v251_v24 = vmul.f32 %v250_v21, %v2675_v18  ;;  %v253_v32 = vmul.f32 %v250_v21, %v2673_v17 }
 0x110   :  { %v277_v46 = vmul.f32 %v2708_v35, %v2675_v18  ;;  %v279_v1 = vmul.f32 %v2708_v35, %v2673_v17 }
 0x111   :  { %237 = vrot.lane.b32.xlu0 %v227_v19, %s2481_s14  ;;  %233 = vrot.lane.b32.xlu1 %v225_v20, %s2481_s14 }
 0x112   :  { %v2684_v23 = vld [vmem:[#allocation2 + $0x8] sm:$0xff]  ;;  %v2688_v26 = vld [vmem:[#allocation2 + $0x20] sm:$0xff] }
 0x113   :  { %v226_v25 = vmul.f32 %v224_v15, %v2684_v23  ;;  %v228_v33 = vmul.f32 %v224_v15, %v2688_v26  ;;  %v252_v47 = vmul.f32 %v250_v21, %v2684_v23  ;;  %v254_v2 = vmul.f32 %v250_v21, %v2688_v26 }
 0x114   :  { %v303_v15 = vmul.f32 %v2732_v57, %v2675_v18  ;;  %v280_v45 = vmul.f32 %v2708_v35, %v2688_v26 }
 0x115   :  { %259 = vrot.lane.b32.xlu0 %v251_v24, %s2481_s14  ;;  %235 = vrot.lane.b32.xlu1 %v226_v25, %s2481_s14  ;;  %v278_v24 = vmul.f32 %v2708_v35, %v2684_v23 }
 0x119   :  { %263 = vrot.lane.b32.xlu0 %v253_v32, %s2481_s14  ;;  %239 = vrot.lane.b32.xlu1 %v228_v33, %s2481_s14 }
 0x11b   :  { %v1409_v48 = vpop.permute.xlu1 %1408  ;;  %v1378_v49 = vpop.permute.xlu0 %1377 }
 0x11c   :  { %v1432_v53 = vmul.f32 %v1415_v36, %v1409_v48  ;;  %v1434_v54 = vmul.f32 %v1423_v37, %v1409_v48  ;;  %v1401_v61 = vmul.f32 %v1384_v41, %v1378_v49  ;;  %v1403_v62 = vmul.f32 %v1392_v43, %v1378_v49 }
 0x11d   :  { %285 = vrot.lane.b32.xlu0 %v277_v46, %s2481_s14  ;;  %261 = vrot.lane.b32.xlu1 %v252_v47, %s2481_s14  ;;  %v1433_v3 = vmul.f32 %v1419_v39, %v1409_v48  ;;  %v1402_v4 = vmul.f32 %v1388_v42, %v1378_v49  ;;  %v1435_v5 = vmul.f32 %v1427_v40, %v1409_v48  ;;  %v328_v48 = vstv %s2743_s26 }
 0x11e   :  { %v1404_v7 = vmul.f32 %v1396_v44, %v1378_v49  ;;  %v1436_v8 = vadd.f32 %v1432_v53, %v1401_v61  ;;  %v1438_v9 = vadd.f32 %v1434_v54, %v1403_v62  ;;  %v1523_v37 = vrot.slane %v2725_v52, %v2696_v28 }
 0x11f   :  { %v1437_v32 = vadd.f32 %v1433_v3, %v1402_v4  ;;  %v1519_v39 = vrot.slane %v2725_v52, %v2701_v29  ;;  %v1527_v42 = vrot.slane %v2725_v52, %v2704_v30  ;;  %v305_v44 = vmul.f32 %v2732_v57, %v2673_v17 }
 0x120   :  { %v1444_v10 = vpop.permute.xlu1 %1443  ;;  %v1479_v11 = vpop.permute.xlu0 %1478  ;;  %v1439_v34 = vadd.f32 %v1435_v5, %v1404_v7  ;;  %v330_v3 = vmul.f32 %v328_v48, %v2684_v23  ;;  %v332_v4 = vmul.f32 %v328_v48, %v2688_v26  ;;  %v2782_v5 = vld [vmem:[#allocation2 + $0x1] sm:$0xff]  ;;  %v414_v7 = vstv %s2072_s18 }
 0x121   :  { %289 = vrot.lane.b32.xlu0 %v279_v1, %s2481_s14  ;;  %265 = vrot.lane.b32.xlu1 %v254_v2, %s2481_s14  ;;  %v1467_v12 = vmul.f32 %v1450_v50, %v1444_v10  ;;  %v1468_v13 = vmul.f32 %v1454_v51, %v1444_v10  ;;  %v1469_v14 = vmul.f32 %v1458_v55, %v1444_v10  ;;  %v354_v1 = vstv %s2068_s16 }
 0x122   :  { %v1470_v19 = vmul.f32 %v1462_v56, %v1444_v10  ;;  %v1502_v20 = vmul.f32 %v1485_v58, %v1479_v11  ;;  %v1504_v21 = vmul.f32 %v1493_v59, %v1479_v11  ;;  %v1503_v33 = vmul.f32 %v1489_v60, %v1479_v11  ;;  %v2788_v10 = vld [vmem:[#allocation2 + $0x19] sm:$0xff] }
 0x123   :  { %v1471_v25 = vadd.f32 %v1467_v12, %v1436_v8  ;;  %v1473_v31 = vadd.f32 %v1469_v14, %v1438_v9  ;;  %v1505_v36 = vmul.f32 %v1497_v63, %v1479_v11  ;;  %v1472_v38 = vadd.f32 %v1468_v13, %v1437_v32  ;;  %v2794_v14 = vld [vmem:[#allocation2 + $0x9] sm:$0xff] }
 0x124   :  { %v1474_v41 = vadd.f32 %v1470_v19, %v1439_v34  ;;  %v329_v55 = vmul.f32 %v328_v48, %v2675_v18  ;;  %v304_v56 = vmul.f32 %v2732_v57, %v2684_v23  ;;  %v331_v63 = vmul.f32 %v328_v48, %v2673_v17 }
 0x125   :  { %311 = vrot.lane.b32.xlu0 %v303_v15, %s2482_s15  ;;  %287 = vrot.lane.b32.xlu1 %v278_v24, %s2481_s14  ;;  %v1506_v40 = vadd.f32 %v1502_v20, %v1471_v25  ;;  %v1508_v43 = vadd.f32 %v1504_v21, %v1473_v31  ;;  %v1507_v46 = vadd.f32 %v1503_v33, %v1472_v38  ;;  %v440_v13 = vstv %s2073_s20  ;;  %v2800_v20 = vld [vmem:[#allocation2 + $0x21] sm:$0xff] }
 0x126   :  { %v1509_v49 = vadd.f32 %v1505_v36, %v1474_v41  ;;  %v355_v2 = vmul.f32 %v354_v1, %v2675_v18  ;;  %v415_v8 = vmul.f32 %v414_v7, %v2782_v5  ;;  %v356_v9 = vmul.f32 %v354_v1, %v2684_v23 }
 0x127   :  { %v1532_v47 = vadd.f32 %v1515_v0, %v1506_v40  ;;  %v1534_v50 = vadd.f32 %v1523_v37, %v1508_v43  ;;  %v1533_v51 = vadd.f32 %v1519_v39, %v1507_v46  ;;  %v306_v0 = vmul.f32 %v2732_v57, %v2688_v26 }
 0x128   :  { %v1535_v52 = vadd.f32 %v1527_v42, %v1509_v49  ;;  %v357_v57 = vmul.f32 %v354_v1, %v2673_v17  ;;  %v417_v11 = vmul.f32 %v414_v7, %v2788_v10  ;;  %v358_v12 = vmul.f32 %v354_v1, %v2688_v26 }
 0x129   :  { %315 = vrot.lane.b32.xlu0 %v305_v44, %s2482_s15  ;;  %291 = vrot.lane.b32.xlu1 %v280_v45, %s2481_s14  ;;  %v1536_v53 = vmax.f32 %v1532_v47, 0.0  ;;  %v1538_v54 = vmax.f32 %v1534_v50, 0.0  ;;  %v1537_v35 = vmax.f32 %v1533_v51, 0.0  ;;  %v441_v15 = vmul.f32 %v440_v13, %v2782_v5  ;;  %v2838_v51 = vld [vmem:[#allocation2 + $0x2] sm:$0xff] }
 0x12a   :  { %v1539_v58 = vmax.f32 %v1535_v52, 0.0  ;;  %v416_v19 = vmul.f32 %v414_v7, %v2794_v14  ;;  %v443_v21 = vmul.f32 %v440_v13, %v2788_v10  ;;  %v418_v24 = vmul.f32 %v414_v7, %v2800_v20 }
 0x12b   :  { %v1540_v59 = vpack.c.bf16 %v1536_v53, %v1536_v53  ;;  %v1541_v60 = vpack.c.bf16 %v1537_v35, %v1537_v35  ;;  %v1542_v62 = vpack.c.bf16 %v1538_v54, %v1538_v54  ;;  %v466_v25 = vstv %s2074_s10 }
 0x12c   :  { %v1543_v61 = vpack.c.bf16 %v1539_v58, %v1539_v58  ;;  %v467_v31 = vmul.f32 %v466_v25, %v2782_v5  ;;  %v442_v32 = vmul.f32 %v440_v13, %v2794_v14  ;;  %v469_v33 = vmul.f32 %v466_v25, %v2788_v10 }
 0x12d   :  { %337 = vrot.lane.b32.xlu0 %v329_v55, %s2482_s15  ;;  %313 = vrot.lane.b32.xlu1 %v304_v56, %s2482_s15  ;;  %v444_v34 = vmul.f32 %v440_v13, %v2800_v20  ;;  %v492_v36 = vstv %s2075_s19  ;;  %v468_v38 = vmul.f32 %v466_v25, %v2794_v14  ;;  %v470_v40 = vmul.f32 %v466_v25, %v2800_v20  ;;  %v2844_v55 = vld [vmem:[#allocation2 + $0x1a] sm:$0xff] }
 0x12e   :  { %1972 = vmatprep.mubr.bf16.mxu1 %v1541_v60  ;;  %2013 = vmatprep.mubr.bf16.mxu0 %v1543_v61  ;;  %v493_v37 = vmul.f32 %v492_v36, %v2782_v5  ;;  %v495_v39 = vmul.f32 %v492_v36, %v2788_v10  ;;  %v518_v41 = vstv %s2076_s21  ;;  %v494_v43 = vmul.f32 %v492_v36, %v2794_v14 }
 0x12f   :  { %1973 = vmatmul.mubr.bf16.vlgmr.msra.gmra.mrb[0].mxu1 %v1540_v59  ;;  %2014 = vmatmul.mubr.bf16.vlgmr.msra.gmra.mrb[0].mxu0 %v1542_v62  ;;  %v519_v42 = vmul.f32 %v518_v41, %v2782_v5  ;;  %v521_v44 = vmul.f32 %v518_v41, %v2788_v10  ;;  %v496_v45 = vmul.f32 %v492_v36, %v2800_v20  ;;  %v544_v46 = vstv %s2077_s4  ;;  %v2850_v59 = vld [vmem:[#allocation2 + $0xa] sm:$0xff]  ;;  %v2856_v62 = vld [vmem:[#allocation2 + $0x22] sm:$0xff] }
 0x130   :  { %v545_v47 = vmul.f32 %v544_v46, %v2782_v5  ;;  %v520_v48 = vmul.f32 %v518_v41, %v2794_v14  ;;  %v547_v49 = vmul.f32 %v544_v46, %v2788_v10  ;;  %v522_v50 = vmul.f32 %v518_v41, %v2800_v20 }
 0x131   :  { %341 = vrot.lane.b32.xlu0 %v331_v63, %s2482_s15  ;;  %317 = vrot.lane.b32.xlu1 %v306_v0, %s2482_s15  ;;  %v604_v53 = vstv %s2081_s17  ;;  %v546_v54 = vmul.f32 %v544_v46, %v2794_v14  ;;  %v548_v35 = vmul.f32 %v544_v46, %v2800_v20  ;;  %v630_v58 = vstv %s2082_s9 }
 0x132   :  { %v605_v52 = vmul.f32 %v604_v53, %v2838_v51  ;;  %v607_v56 = vmul.f32 %v604_v53, %v2844_v55  ;;  %v631_v60 = vmul.f32 %v630_v58, %v2838_v51  ;;  %v606_v61 = vmul.f32 %v604_v53, %v2850_v59 }
 0x133   :  { %v633_v63 = vmul.f32 %v630_v58, %v2844_v55  ;;  %v608_v0 = vmul.f32 %v604_v53, %v2856_v62  ;;  %v656_v1 = vstv %s2083_s22  ;;  %v206_v7 = vstv %s205_s23 }
 0x135   :  { %363 = vrot.lane.b32.xlu0 %v355_v2, %s2482_s15  ;;  %339 = vrot.lane.b32.xlu1 %v330_v3, %s2482_s15  ;;  %v657_v2 = vmul.f32 %v656_v1, %v2838_v51  ;;  %v632_v3 = vmul.f32 %v630_v58, %v2850_v59 }
 0x139   :  { %367 = vrot.lane.b32.xlu0 %v357_v57, %s2482_s15  ;;  %343 = vrot.lane.b32.xlu1 %v332_v4, %s2482_s15  ;;  %v659_v57 = vmul.f32 %v656_v1, %v2844_v55  ;;  %v634_v4 = vmul.f32 %v630_v58, %v2856_v62 }
 0x13d   :  { %423 = vrot.lane.b32.xlu0 %v415_v8, %s2481_s14  ;;  %365 = vrot.lane.b32.xlu1 %v356_v9, %s2482_s15  ;;  %v682_v8 = vstv %s2084_s25  ;;  %v209_v9 = vmul.f32 %v206_v7, %v2673_v17 }
 0x13e   :  { %v685_v36 = vmul.f32 %v682_v8, %v2844_v55  ;;  %v684_v46 = vmul.f32 %v682_v8, %v2850_v59 }
 0x141   :  { %427 = vrot.lane.b32.xlu0 %v417_v11, %s2481_s14  ;;  %369 = vrot.lane.b32.xlu1 %v358_v12, %s2482_s15  ;;  %v207_v11 = vmul.f32 %v206_v7, %v2675_v18 }
 0x145   :  { %449 = vrot.lane.b32.xlu0 %v441_v15, %s2481_s14  ;;  %425 = vrot.lane.b32.xlu1 %v416_v19, %s2481_s14  ;;  %v683_v15 = vmul.f32 %v682_v8, %v2838_v51  ;;  %v658_v19 = vmul.f32 %v656_v1, %v2850_v59 }
 0x149   :  { %453 = vrot.lane.b32.xlu0 %v443_v21, %s2481_s14  ;;  %429 = vrot.lane.b32.xlu1 %v418_v24, %s2481_s14  ;;  %v212_v21 = vstv %s2061_s27 }
 0x14a   :  { %v215_v41 = vmul.f32 %v212_v21, %v2673_v17  ;;  %v214_v53 = vmul.f32 %v212_v21, %v2684_v23 }
 0x14d   :  { %475 = vrot.lane.b32.xlu0 %v467_v31, %s2481_s14  ;;  %451 = vrot.lane.b32.xlu1 %v442_v32, %s2481_s14  ;;  %v213_v31 = vmul.f32 %v212_v21, %v2675_v18  ;;  %v208_v32 = vmul.f32 %v206_v7, %v2684_v23 }
 0x151   :  { %479 = vrot.lane.b32.xlu0 %v469_v33, %s2481_s14  ;;  %455 = vrot.lane.b32.xlu1 %v444_v34, %s2481_s14 }
 0x155   :  { %501 = vrot.lane.b32.xlu0 %v493_v37, %s2482_s15  ;;  %477 = vrot.lane.b32.xlu1 %v468_v38, %s2481_s14  ;;  %v660_v37 = vmul.f32 %v656_v1, %v2856_v62 }
 0x159   :  { %505 = vrot.lane.b32.xlu0 %v495_v39, %s2482_s15  ;;  %481 = vrot.lane.b32.xlu1 %v470_v40, %s2481_s14  ;;  %v708_v40 = vstv %s2085_s8 }
 0x15d   :  { %527 = vrot.lane.b32.xlu0 %v519_v42, %s2482_s15  ;;  %503 = vrot.lane.b32.xlu1 %v494_v43, %s2482_s15  ;;  %v210_v42 = vmul.f32 %v206_v7, %v2688_v26  ;;  %v384_v7 = vstv %s2069_s28 }
 0x161   :  { %531 = vrot.lane.b32.xlu0 %v521_v44, %s2482_s15  ;;  %507 = vrot.lane.b32.xlu1 %v496_v45, %s2482_s15  ;;  %v709_v45 = vmul.f32 %v708_v40, %v2838_v51 }
 0x165   :  { %553 = vrot.lane.b32.xlu0 %v545_v47, %s2482_s15  ;;  %529 = vrot.lane.b32.xlu1 %v520_v48, %s2482_s15  ;;  %v218_v47 = vstv %s2062_s11 }
 0x169   :  { %557 = vrot.lane.b32.xlu0 %v547_v49, %s2482_s15  ;;  %533 = vrot.lane.b32.xlu1 %v522_v50, %s2482_s15  ;;  %v219_v50 = vmul.f32 %v218_v47, %v2675_v18 }
 0x16d   :  { %613 = vrot.lane.b32.xlu0 %v605_v52, %s2481_s14  ;;  %555 = vrot.lane.b32.xlu1 %v546_v54, %s2482_s15 }
 0x171   :  { %617 = vrot.lane.b32.xlu0 %v607_v56, %s2481_s14  ;;  %559 = vrot.lane.b32.xlu1 %v548_v35, %s2482_s15  ;;  %v711_v56 = vmul.f32 %v708_v40, %v2844_v55  ;;  %v686_v35 = vmul.f32 %v682_v8, %v2856_v62  ;;  %v220_v8 = vmul.f32 %v218_v47, %v2684_v23 }
 0x175   :  { %639 = vrot.lane.b32.xlu0 %v631_v60, %s2481_s14  ;;  %615 = vrot.lane.b32.xlu1 %v606_v61, %s2481_s14  ;;  %v734_v61 = vstv %s2086_s2 }
 0x176   :  { %v736_v23 = vmul.f32 %v734_v61, %v2850_v59 }
 0x179   :  { %643 = vrot.lane.b32.xlu0 %v633_v63, %s2481_s14  ;;  %619 = vrot.lane.b32.xlu1 %v608_v0, %s2481_s14  ;;  %v221_v63 = vmul.f32 %v218_v47, %v2673_v17  ;;  %v216_v0 = vmul.f32 %v212_v21, %v2688_v26  ;;  %v222_v21 = vmul.f32 %v218_v47, %v2688_v26 }
 0x17d   :  { %665 = vrot.lane.b32.xlu0 %v657_v2, %s2481_s14  ;;  %641 = vrot.lane.b32.xlu1 %v632_v3, %s2481_s14  ;;  %v735_v2 = vmul.f32 %v734_v61, %v2838_v51  ;;  %v710_v3 = vmul.f32 %v708_v40, %v2850_v59 }
 0x181   :  { %669 = vrot.lane.b32.xlu0 %v659_v57, %s2481_s14  ;;  %645 = vrot.lane.b32.xlu1 %v634_v4, %s2481_s14 }
 0x183   :  { %v238_v12 = vpop.permute.xlu0 %237  ;;  %v234_v13 = vpop.permute.xlu1 %233 }
 0x184   :  { %v2876_v24 = vadd.f32 %v238_v12, %v209_v9  ;;  %v245_v25 = vadd.f32 %v234_v13, %v207_v11  ;;  %v737_v11 = vmul.f32 %v734_v61, %v2844_v55  ;;  %v712_v12 = vmul.f32 %v708_v40, %v2856_v62 }
 0x185   :  { %691 = vrot.lane.b32.xlu0 %v683_v15, %s2482_s15  ;;  %667 = vrot.lane.b32.xlu1 %v658_v19, %s2481_s14  ;;  %v385_v19 = vmul.f32 %v384_v7, %v2782_v5 }
 0x187   :  { %v260_v33 = vpop.permute.xlu0 %259  ;;  %v236_v34 = vpop.permute.xlu1 %235 }
 0x188   :  { %v2884_v38 = vadd.f32 %v260_v33, %v213_v31  ;;  %v2886_v39 = vadd.f32 %v236_v34, %v208_v32 }
 0x189   :  { %695 = vrot.lane.b32.xlu0 %v685_v36, %s2482_s15  ;;  %671 = vrot.lane.b32.xlu1 %v660_v37, %s2481_s14  ;;  %v387_v37 = vmul.f32 %v384_v7, %v2788_v10  ;;  %s2088_s14 = sld [smem:[#allocation8 + $0x2]] }
 0x18b   :  { %v264_v43 = vpop.permute.xlu0 %263  ;;  %v240_v44 = vpop.permute.xlu1 %239 }
 0x18c   :  { %v273_v48 = vadd.f32 %v264_v43, %v215_v41  ;;  %v248_v49 = vadd.f32 %v240_v44, %v210_v42  ;;  %v738_v43 = vmul.f32 %v734_v61, %v2856_v62  ;;  %v404_v61 = vstv %s2071_s30 }
 0x18d   :  { %717 = vrot.lane.b32.xlu0 %v709_v45, %s2482_s15  ;;  %693 = vrot.lane.b32.xlu1 %v684_v46, %s2482_s15 }
 0x18f   :  { %v286_v52 = vpop.permute.xlu0 %285  ;;  %v262_v54 = vpop.permute.xlu1 %261 }
 0x190   :  { %v297_v58 = vadd.f32 %v286_v52, %v219_v50  ;;  %v272_v60 = vadd.f32 %v262_v54, %v214_v53 }
 0x191   :  { %721 = vrot.lane.b32.xlu0 %v711_v56, %s2482_s15  ;;  %697 = vrot.lane.b32.xlu1 %v686_v35, %s2482_s15  ;;  %v388_v35 = vmul.f32 %v384_v7, %v2800_v20 }
 0x193   :  { %v290_v18 = vpop.permute.xlu0 %289  ;;  %v266_v1 = vpop.permute.xlu1 %265 }
 0x194   :  { %v299_v57 = vadd.f32 %v290_v18, %v221_v63  ;;  %v274_v4 = vadd.f32 %v266_v1, %v216_v0 }
 0x195   :  { %743 = vrot.lane.b32.xlu0 %v735_v2, %s2482_s15  ;;  %719 = vrot.lane.b32.xlu1 %v710_v3, %s2482_s15  ;;  %v405_v2 = vmul.f32 %v404_v61, %v2782_v5 }
 0x197   :  { %v312_v9 = vpop.permute.xlu0 %311  ;;  %v288_v17 = vpop.permute.xlu1 %287 }
 0x198   :  { %v323_v13 = vadd.f32 %v312_v9, %v245_v25  ;;  %v298_v15 = vadd.f32 %v288_v17, %v220_v8  ;;  %v394_v25 = vstv %s2070_s29 }
 0x199   :  { %747 = vrot.lane.b32.xlu0 %v737_v11, %s2482_s15  ;;  %723 = vrot.lane.b32.xlu1 %v712_v12, %s2482_s15  ;;  %v395_v45 = vmul.f32 %v394_v25, %v2782_v5  ;;  %v397_v56 = vmul.f32 %v394_v25, %v2788_v10  ;;  %v396_v3 = vmul.f32 %v394_v25, %v2794_v14 }
 0x19a   :  { %v389_v31 = vadd.f32 %v385_v19, %v323_v13  ;;  %v407_v12 = vmul.f32 %v404_v61, %v2788_v10  ;;  %v406_v5 = vmul.f32 %v404_v61, %v2794_v14 }
 0x19b   :  { %v316_v32 = vpop.permute.xlu0 %315  ;;  %v292_v33 = vpop.permute.xlu1 %291 }
 0x19c   :  { %v325_v34 = vadd.f32 %v316_v32, %v2876_v24  ;;  %v300_v36 = vadd.f32 %v292_v33, %v222_v21  ;;  %v386_v24 = vmul.f32 %v384_v7, %v2794_v14  ;;  %v398_v7 = vmul.f32 %v394_v25, %v2800_v20 }
 0x19d   :  { %745 = vrot.lane.b32.xlu1 %v736_v23, %s2482_s15 }
 0x19e   :  { %v391_v40 = vadd.f32 %v387_v37, %v325_v34 }
 0x19f   :  { %v338_v41 = vpop.permute.xlu0 %337  ;;  %v314_v42 = vpop.permute.xlu1 %313 }
 0x1a0   :  { %v349_v26 = vadd.f32 %v338_v41, %v2884_v38  ;;  %v324_v44 = vadd.f32 %v314_v42, %v2886_v39 }
 0x1a1   :  { %749 = vrot.lane.b32.xlu1 %v738_v43, %s2482_s15 }
 0x1a2   :  { %v399_v46 = vadd.f32 %v395_v45, %v349_v26  ;;  %v390_v47 = vadd.f32 %v386_v24, %v324_v44 }
 0x1a3   :  { %v342_v50 = vpop.permute.xlu0 %341  ;;  %v318_v53 = vpop.permute.xlu1 %317 }
 0x1a4   :  { %v351_v52 = vadd.f32 %v342_v50, %v273_v48  ;;  %v326_v54 = vadd.f32 %v318_v53, %v248_v49 }
 0x1a6   :  { %v401_v38 = vadd.f32 %v397_v56, %v351_v52  ;;  %v392_v63 = vadd.f32 %v388_v35, %v326_v54  ;;  %v574_v54 = vstv %s2078_s0 }
 0x1a7   :  { %v364_v39 = vpop.permute.xlu0 %363  ;;  %v340_v0 = vpop.permute.xlu1 %339 }
 0x1a8   :  { %v375_v18 = vadd.f32 %v364_v39, %v297_v58  ;;  %v350_v1 = vadd.f32 %v340_v0, %v272_v60 }
 0x1aa   :  { %v409_v8 = vadd.f32 %v405_v2, %v375_v18  ;;  %v400_v9 = vadd.f32 %v396_v3, %v350_v1  ;;  %v577_v18 = vmul.f32 %v574_v54, %v2844_v55  ;;  %v584_v1 = vstv %s2079_s3 }
 0x1ab   :  { %v368_v17 = vpop.permute.xlu0 %367  ;;  %v344_v48 = vpop.permute.xlu1 %343 }
 0x1ac   :  { %v377_v49 = vadd.f32 %v368_v17, %v299_v57  ;;  %v352_v11 = vadd.f32 %v344_v48, %v274_v4  ;;  %v408_v57 = vmul.f32 %v404_v61, %v2800_v20  ;;  %v585_v48 = vmul.f32 %v584_v1, %v2838_v51 }
 0x1ae   :  { %v411_v13 = vadd.f32 %v407_v12, %v377_v49  ;;  %v402_v19 = vadd.f32 %v398_v7, %v352_v11  ;;  %v576_v49 = vmul.f32 %v574_v54, %v2850_v59 }
 0x1af   :  { %v424_v21 = vpop.permute.xlu0 %423  ;;  %v366_v32 = vpop.permute.xlu1 %365 }
 0x1b0   :  { %v435_v58 = vadd.f32 %v424_v21, %v389_v31  ;;  %v376_v60 = vadd.f32 %v366_v32, %v298_v15  ;;  %v587_v32 = vmul.f32 %v584_v1, %v2844_v55 }
 0x1b2   :  { %v410_v33 = vadd.f32 %v406_v5, %v376_v60  ;;  %v594_v60 = vstv %s2080_s1 }
 0x1b3   :  { %v428_v23 = vpop.permute.xlu0 %427  ;;  %v370_v34 = vpop.permute.xlu1 %369 }
 0x1b4   :  { %v437_v37 = vadd.f32 %v428_v23, %v391_v40  ;;  %v378_v41 = vadd.f32 %v370_v34, %v300_v36 }
 0x1b6   :  { %v412_v4 = vadd.f32 %v408_v57, %v378_v41  ;;  %v595_v57 = vmul.f32 %v594_v60, %v2838_v51 }
 0x1b7   :  { %v450_v42 = vpop.permute.xlu0 %449  ;;  %v426_v10 = vpop.permute.xlu1 %425 }
 0x1b8   :  { %v461_v43 = vadd.f32 %v450_v42, %v399_v46  ;;  %v436_v25 = vadd.f32 %v426_v10, %v390_v47  ;;  %v575_v47 = vmul.f32 %v574_v54, %v2838_v51 }
 0x1bb   :  { %v454_v26 = vpop.permute.xlu0 %453  ;;  %v430_v44 = vpop.permute.xlu1 %429 }
 0x1bc   :  { %v463_v45 = vadd.f32 %v454_v26, %v401_v38  ;;  %v438_v24 = vadd.f32 %v430_v44, %v392_v63 }
 0x1bf   :  { %v476_v15 = vpop.permute.xlu0 %475  ;;  %v452_v31 = vpop.permute.xlu1 %451 }
 0x1c0   :  { %v487_v14 = vadd.f32 %v476_v15, %v409_v8  ;;  %v462_v50 = vadd.f32 %v452_v31, %v400_v9 }
 0x1c3   :  { %v480_v53 = vpop.permute.xlu0 %479  ;;  %v456_v52 = vpop.permute.xlu1 %455 }
 0x1c4   :  { %v489_v40 = vadd.f32 %v480_v53, %v411_v13  ;;  %v464_v36 = vadd.f32 %v456_v52, %v402_v19  ;;  %v596_v53 = vmul.f32 %v594_v60, %v2850_v59 }
 0x1c7   :  { %v502_v20 = vpop.permute.xlu0 %501  ;;  %v478_v56 = vpop.permute.xlu1 %477 }
 0x1c8   :  { %v513_v35 = vadd.f32 %v502_v20, %v435_v58  ;;  %v488_v46 = vadd.f32 %v478_v56, %v410_v33  ;;  %v578_v58 = vmul.f32 %v574_v54, %v2856_v62 }
 0x1ca   :  { %v2934_v61 = vadd.f32 %v575_v47, %v513_v35 }
 0x1cb   :  { %v506_v38 = vpop.permute.xlu0 %505  ;;  %v482_v63 = vpop.permute.xlu1 %481 }
 0x1cc   :  { %v515_v39 = vadd.f32 %v506_v38, %v437_v37  ;;  %v490_v0 = vadd.f32 %v482_v63, %v412_v4  ;;  %v586_v4 = vmul.f32 %v584_v1, %v2850_v59  ;;  %v2970_v63 = vand.u32 127, %v184_v16 }
 0x1cd   :  { %v189_v59 = vand.u32 1, %v2680_v22  ;;  %v186_v16 = vadd.s32 8, %v2680_v22 }
 0x1ce   :  { %v2937_v2 = vadd.f32 %v577_v18, %v515_v39  ;;  %v193_v18 = vand.u32 1, %v2970_v63 }
 0x1cf   :  { %v528_v3 = vpop.permute.xlu0 %527  ;;  %v504_v8 = vpop.permute.xlu1 %503  ;;  %vm2980_vm3 = vcmp.eq.s32.totalorder %v189_v59, 0 }
 0x1d0   :  { %v539_v9 = vadd.f32 %v528_v3, %v461_v43  ;;  %v514_v17 = vadd.f32 %v504_v8, %v436_v25  ;;  %vm2984_vm4 = vcmp.eq.s32.totalorder %v193_v18, 0 }
 0x1d1   :  { %vm195_vm5 = vmand %vm2980_vm3, %vm2984_vm4 }
 0x1d2   :  { %v2941_v11 = vadd.f32 %v585_v48, %v539_v9  ;;  %v2943_v12 = vadd.f32 %v576_v49, %v514_v17  ;;  %v760_v9 = vstv %s759_s7 }
 0x1d3   :  { %v532_v7 = vpop.permute.xlu0 %531  ;;  %v508_v13 = vpop.permute.xlu1 %507 }
 0x1d4   :  { %v541_v19 = vadd.f32 %v532_v7, %v463_v45  ;;  %v516_v21 = vadd.f32 %v508_v13, %v438_v24  ;;  %v597_v45 = vmul.f32 %v594_v60, %v2844_v55  ;;  %v588_v24 = vmul.f32 %v584_v1, %v2856_v62 }
 0x1d5   :  { %v190_v7 = vand.u32 1, %v186_v16 }
 0x1d6   :  { %v2947_v5 = vadd.f32 %v587_v32, %v541_v19  ;;  %v2949_v33 = vadd.f32 %v578_v58, %v516_v21 }
 0x1d7   :  { %v554_v23 = vpop.permute.xlu0 %553  ;;  %v530_v34 = vpop.permute.xlu1 %529  ;;  %vm3002_vm7 = vcmp.eq.s32.totalorder %v190_v7, 0 }
 0x1d8   :  { %v565_v37 = vadd.f32 %v554_v23, %v487_v14  ;;  %v540_v41 = vadd.f32 %v530_v34, %v462_v50  ;;  %vm196_vm8 = vmand %vm3002_vm7, %vm2984_vm4 }
 0x1da   :  { %v2953_v42 = vadd.f32 %v595_v57, %v565_v37  ;;  %v2955_v10 = vadd.f32 %v586_v4, %v540_v41  ;;  %v1608_v57 = vld [vmem:[#allocation16] sm:$0x3]  ;;  %v3009_v4 = vstv %s2087_s24 }
 0x1db   :  { %v558_v43 = vpop.permute.xlu0 %557  ;;  %v534_v25 = vpop.permute.xlu1 %533 }
 0x1dc   :  { %v567_v26 = vadd.f32 %v558_v43, %v489_v40  ;;  %v542_v44 = vadd.f32 %v534_v25, %v464_v36  ;;  %v598_v40 = vmul.f32 %v594_v60, %v2856_v62 }
 0x1de   :  { %v2959_v15 = vadd.f32 %v597_v45, %v567_v26  ;;  %v2961_v31 = vadd.f32 %v588_v24, %v542_v44 }
 0x1df   :  { %v614_v14 = vpop.permute.xlu0 %613  ;;  %v556_v51 = vpop.permute.xlu1 %555 }
 0x1e0   :  { %v566_v50 = vadd.f32 %v556_v51, %v488_v46  ;;  %v625_v8 = vadd.f32 %v614_v14, %v2934_v61  ;;  %v3000_v61 = vsel %vm195_vm5, 1.0, %v2478_v6 }
 0x1e2   :  { %v2964_v52 = vadd.f32 %v596_v53, %v566_v50 }
 0x1e3   :  { %v618_v54 = vpop.permute.xlu0 %617  ;;  %v560_v20 = vpop.permute.xlu1 %559 }
 0x1e4   :  { %v568_v56 = vadd.f32 %v560_v20, %v490_v0  ;;  %v627_v13 = vadd.f32 %v618_v54, %v2937_v2  ;;  %v2024_v54 = vld [vmem:[#allocation18] sm:$0x3] }
 0x1e6   :  { %v2967_v36 = vadd.f32 %v598_v40, %v568_v56  ;;  %v3021_v40 = vstv %s2088_s14 }
 0x1e7   :  { %v640_v55 = vpop.permute.xlu0 %639  ;;  %v616_v35 = vpop.permute.xlu1 %615 }
 0x1e8   :  { %v651_v34 = vadd.f32 %v640_v55, %v2941_v11  ;;  %v626_v37 = vadd.f32 %v616_v35, %v2943_v12  ;;  %v1613_v12 = vrot.slane %v1608_v57, %v2693_v27  ;;  %v3024_v55 = vsel %vm196_vm8, 1.0, %v2478_v6 }
 0x1eb   :  { %v644_v47 = vpop.permute.xlu0 %643  ;;  %v620_v38 = vpop.permute.xlu1 %619 }
 0x1ec   :  { %v653_v11 = vadd.f32 %v644_v47, %v2947_v5  ;;  %v628_v14 = vadd.f32 %v620_v38, %v2949_v33  ;;  %v1617_v5 = vrot.slane %v1608_v57, %v2701_v29 }
 0x1ef   :  { %v666_v39 = vpop.permute.xlu0 %665  ;;  %v2972_v46 = vpop.permute.xlu1 %641 }
 0x1f0   :  { %v677_v38 = vadd.f32 %v666_v39, %v2953_v42  ;;  %v652_v6 = vadd.f32 %v2972_v46, %v2955_v10 }
 0x1f3   :  { %v2976_v0 = vpop.permute.xlu0 %669  ;;  %v2978_v62 = vpop.permute.xlu1 %645 }
 0x1f4   :  { %v679_v42 = vadd.f32 %v2976_v0, %v2959_v15  ;;  %v654_v15 = vadd.f32 %v2978_v62, %v2961_v31 }
 0x1f7   :  { %v692_v17 = vpop.permute.xlu0 %691  ;;  %v2990_v48 = vpop.permute.xlu1 %667 }
 0x1f8   :  { %v703_v49 = vadd.f32 %v692_v17, %v625_v8  ;;  %v2029_v8 = vrot.slane %v2024_v54, %v2693_v27 }
 0x1fa   :  { %v761_v19 = vadd.f32 %v760_v9, %v703_v49 }
 0x1fb   :  { %v696_v21 = vpop.permute.xlu0 %695  ;;  %v2997_v32 = vpop.permute.xlu1 %671 }
 0x1fc   :  { %v765_v58 = vmax.f32 %v761_v19, 0.0  ;;  %v705_v60 = vadd.f32 %v696_v21, %v627_v13 }
 0x1fe   :  { %v763_v2 = vadd.f32 %v760_v9, %v705_v60  ;;  %v769_v41 = vmul.f32 %v3000_v61, %v765_v58 }
 0x1ff   :  { %v718_v43 = vpop.permute.xlu0 %717  ;;  %v694_v25 = vpop.permute.xlu1 %693 }
 0x200   :  { %v767_v26 = vmax.f32 %v763_v2, 0.0  ;;  %v729_v44 = vadd.f32 %v718_v43, %v651_v34  ;;  %v704_v45 = vadd.f32 %v694_v25, %v626_v37  ;;  %v774_v24 = vsel %vm773_vm6, %v769_v41, 0.0 }
 0x201   :  { %775 = vadd.xlane.f32.xlu0 %v774_v24  ;;  %v2033_v34 = vrot.slane %v2024_v54, %v2701_v29 }
 0x202   :  { %v820_v51 = vadd.f32 %v3009_v4, %v729_v44  ;;  %v762_v50 = vadd.f32 %v760_v9, %v704_v45  ;;  %v771_v53 = vmul.f32 %v3000_v61, %v767_v26  ;;  %v1974_v33 = vpop.f32.mrb[0].mxu1  ;;  %v2015_v16 = vpop.f32.mrb[0].mxu0 }
 0x203   :  { %v722_v20 = vpop.permute.xlu0 %721  ;;  %v698_v56 = vpop.permute.xlu1 %697  ;;  %v1975_v3 = vadd.f32 %v1974_v33, %v1613_v12 }
 0x204   :  { %v824_v35 = vmax.f32 %v820_v51, 0.0  ;;  %v766_v47 = vmax.f32 %v762_v50, 0.0  ;;  %v731_v59 = vadd.f32 %v722_v20, %v653_v11  ;;  %v706_v18 = vadd.f32 %v698_v56, %v628_v14  ;;  %v1976_v17 = vpop.f32.mrb[1].mxu1  ;;  %v2017_v19 = vpop.f32.mrb[1].mxu0 }
 0x205   :  { %v780_v1 = vsel %vm773_vm6, %v771_v53, 0.0  ;;  %v1978_v21 = vpop.f32.mrb[2].mxu1  ;;  %v2016_v60 = vadd.f32 %v2015_v16, %v1975_v3  ;;  %v1977_v23 = vadd.f32 %v1976_v17, %v1617_v5  ;;  %v678_v11 = vadd.f32 %v2990_v48, %v2964_v52 }
 0x206   :  { %v822_v49 = vadd.f32 %v3009_v4, %v731_v59  ;;  %v764_v7 = vadd.f32 %v760_v9, %v706_v18  ;;  %781 = vadd.xlane.f32.xlu0 %v780_v1  ;;  %v770_v13 = vmul.f32 %v3024_v55, %v766_v47  ;;  %v828_v46 = vmul.f32 %v3000_v61, %v824_v35  ;;  %v2019_v9 = vpop.f32.mrb[2].mxu0  ;;  %v1979_v41 = vpop.f32.mrb[3].mxu1 }
 0x207   :  { %v744_v39 = vpop.permute.xlu0 %743  ;;  %v720_v58 = vpop.permute.xlu1 %719  ;;  %v2022_v25 = vmax.f32 %v2016_v60, 0.0  ;;  %v2018_v26 = vadd.f32 %v2017_v19, %v1977_v23  ;;  %v792_v41 = vsub.s32 %v2970_v63, %v2680_v22 }
 0x208   :  { %v768_v37 = vmax.f32 %v764_v7, 0.0  ;;  %v755_v2 = vadd.f32 %v744_v39, %v677_v38  ;;  %v730_v10 = vadd.f32 %v720_v58, %v652_v6  ;;  %v826_v57 = vmax.f32 %v822_v49, 0.0  ;;  %v2020_v44 = vpop.f32.mrb[3].mxu0 }
 0x209   :  { %v777_v43 = vsel %vm773_vm6, %v770_v13, 0.0  ;;  %v2036_v51 = vmul.f32 %v2029_v8, %v2022_v25  ;;  %v2023_v50 = vmax.f32 %v2018_v26, 0.0  ;;  %v832_v31 = vsel %vm773_vm6, %v828_v46, 0.0 }
 0x20a   :  { %v874_v0 = vadd.f32 %v3021_v40, %v755_v2  ;;  %v821_v45 = vadd.f32 %v3009_v4, %v730_v10  ;;  %778 = vadd.xlane.f32.xlu1 %v777_v43  ;;  %v772_v24 = vmul.f32 %v3024_v55, %v768_v37  ;;  %v830_v5 = vmul.f32 %v3000_v61, %v826_v57 }
 0x20b   :  { %v748_v12 = vpop.permute.xlu0 %747  ;;  %v724_v14 = vpop.permute.xlu1 %723  ;;  %v2037_v35 = vmul.f32 %v2033_v34, %v2023_v50  ;;  %v2038_v59 = vsel %vm1347_vm9, %v2036_v51, 0.0 }
 0x20c   :  { %v825_v53 = vmax.f32 %v821_v45, 0.0  ;;  %v757_v54 = vadd.f32 %v748_v12, %v679_v42  ;;  %v732_v20 = vadd.f32 %v724_v14, %v654_v15  ;;  %v878_v62 = vmax.f32 %v874_v0, 0.0 }
 0x20d   :  { %v783_v56 = vsel %vm773_vm6, %v772_v24, 0.0  ;;  %v2039_v33 = vsel %vm1347_vm9, %v2037_v35, 0.0  ;;  %v838_v8 = vsel %vm773_vm6, %v830_v5, 0.0 }
 0x20e   :  { %v876_v47 = vadd.f32 %v3021_v40, %v757_v54  ;;  %v823_v52 = vadd.f32 %v3009_v4, %v732_v20  ;;  %833 = vadd.xlane.f32.xlu1 %v832_v31  ;;  %784 = vadd.xlane.f32.xlu0 %v783_v56  ;;  %v829_v48 = vmul.f32 %v3024_v55, %v825_v53 }
 0x20f   :  { %v746_v18 = vpop.permute.xlu1 %745  ;;  %v882_v17 = vmul.f32 %v3000_v61, %v878_v62  ;;  %v3057_v6 = vadd.f32 %v2039_v33, %v2038_v59  ;;  %v680_v4 = vadd.f32 %v2997_v32, %v2967_v36 }
 0x210   :  { %v827_v38 = vmax.f32 %v823_v52, 0.0  ;;  %v756_v1 = vadd.f32 %v746_v18, %v678_v11  ;;  %v835_v3 = vsel %vm773_vm6, %v829_v48, 0.0  ;;  %v880_v16 = vmax.f32 %v876_v47, 0.0 }
 0x211   :  { %v886_v39 = vsel %vm773_vm6, %v882_v17, 0.0  ;;  %v3094_v17 = vld [vmem:[#allocation9 + $0x20] ss:$4 sm:$0xf] }
 0x212   :  { %v875_v49 = vadd.f32 %v3021_v40, %v756_v1  ;;  %839 = vadd.xlane.f32.xlu1 %v838_v8  ;;  %836 = vadd.xlane.f32.xlu0 %v835_v3  ;;  %v831_v7 = vmul.f32 %v3024_v55, %v827_v38  ;;  %v884_v58 = vmul.f32 %v3000_v61, %v880_v16  ;;  %v794_v61 = vadd.s32 4294967288, %v2970_v63  ;;  %v3089_v16 = vld [vmem:[#allocation9] ss:$4 sm:$0xff] }
 0x213   :  { %v750_v13 = vpop.permute.xlu1 %749  ;;  %v3092_v8 = vsub.s32 4, %v2680_v22 }
 0x214   :  { %v879_v19 = vmax.f32 %v875_v49, 0.0  ;;  %v758_v21 = vadd.f32 %v750_v13, %v680_v4  ;;  %v841_v42 = vsel %vm773_vm6, %v831_v7, 0.0  ;;  %v892_v34 = vsel %vm773_vm6, %v884_v58, 0.0 }
 0x215   :  { %v3097_v4 = vsub.s32 5, %v2680_v22  ;;  %v3100_v49 = vsub.s32 6, %v2680_v22  ;;  %v3103_v7 = vsub.s32 7, %v2680_v22  ;;  %v934_v13 = vrot.slane %v3089_v16, %v2693_v27 }
 0x216   :  { %v877_v60 = vadd.f32 %v3021_v40, %v758_v21  ;;  %887 = vadd.xlane.f32.xlu1 %v886_v39  ;;  %842 = vadd.xlane.f32.xlu0 %v841_v42  ;;  %v883_v36 = vmul.f32 %v3024_v55, %v879_v19  ;;  %v797_v40 = vsub.s32 %v794_v61, %v2680_v22 }
 0x217   :  { %v938_v19 = vrot.slane %v3089_v16, %v2701_v29  ;;  %v942_v21 = vrot.slane %v3089_v16, %v2696_v28  ;;  %v946_v42 = vrot.slane %v3089_v16, %v2704_v30  ;;  %v950_v39 = vrot.slane %v3089_v16, %v3092_v8 }
 0x218   :  { %v881_v32 = vmax.f32 %v877_v60, 0.0  ;;  %v889_v23 = vsel %vm773_vm6, %v883_v36, 0.0  ;;  %v966_v22 = vrot.slane %v3094_v17, %v2693_v27  ;;  %v970_v58 = vrot.slane %v3094_v17, %v2701_v29 }
 0x219   :  { %v974_v60 = vrot.slane %v3094_v17, %v2696_v28 }
 0x21a   :  { %893 = vadd.xlane.f32.xlu1 %v892_v34  ;;  %890 = vadd.xlane.f32.xlu0 %v889_v23  ;;  %v885_v37 = vmul.f32 %v3024_v55, %v881_v32  ;;  %v3125_v32 = vld [vmem:[#allocation9 + $0x21] ss:$4 sm:$0xf]  ;;  %v954_v23 = vrot.slane %v3089_v16, %v3097_v4  ;;  %v958_v34 = vrot.slane %v3089_v16, %v3100_v49 }
 0x21c   :  { %v895_v2 = vsel %vm773_vm6, %v885_v37, 0.0  ;;  %v962_v37 = vrot.slane %v3089_v16, %v3103_v7 }
 0x21e   :  { %896 = vadd.xlane.f32.xlu0 %v895_v2 }
 0x28e   :  { %v776_v10 = vpop.xlane.xlu0 %775 }
 0x28f   :  { %v793_v26 = vrot.slane %v776_v10, %v792_v41  ;;  %v3135_v10 = vld [vmem:[#allocation9 + $0x2] ss:$4 sm:$0xff] }
 0x293   :  { %v782_v46 = vpop.xlane.xlu0 %781 }
 0x294   :  { %v804_v44 = vrot.slane %v782_v46, %v792_v41 }
 0x297   :  { %v779_v9 = vpop.xlane.xlu1 %778 }
 0x298   :  { %v798_v57 = vrot.slane %v779_v9, %v797_v40 }
 0x29a   :  { %v800_v15 = vsel %vm799_vm10, %v798_v57, %v793_v26  ;;  %v3153_v26 = vld [vmem:[#allocation9 + $0x22] ss:$4 sm:$0xf] }
 0x29b   :  { %v834_v43 = vpop.xlane.xlu1 %833  ;;  %v785_v25 = vpop.xlane.xlu0 %784 }
 0x29c   :  { %v808_v55 = vrot.slane %v785_v25, %v797_v40  ;;  %v851_v50 = vrot.slane %v834_v43, %v792_v41  ;;  %v1044_v25 = vrot.slane %v3125_v32, %v2693_v27 }
 0x29e   :  { %v809_v0 = vsel %vm799_vm10, %v808_v55, %v804_v44 }
 0x29f   :  { %v840_v45 = vpop.xlane.xlu1 %839  ;;  %v837_v24 = vpop.xlane.xlu0 %836  ;;  %v811_v11 = vsel %vm810_vm11, %v809_v0, %v800_v15  ;;  %v1102_v0 = vrot.slane %v3135_v10, %v2693_v27 }
 0x2a0   :  { %v814_v12 = vsel %vm813_vm12, %v811_v11, 0.0  ;;  %v855_v63 = vrot.slane %v837_v24, %v797_v40  ;;  %v860_v53 = vrot.slane %v840_v45, %v792_v41  ;;  %v1106_v11 = vrot.slane %v3135_v10, %v2701_v29 }
 0x2a1   :  { %815 = vadd.xlane.f32.xlu1 %v814_v12  ;;  %v1110_v12 = vrot.slane %v3135_v10, %v2696_v28 }
 0x2a2   :  { %v856_v20 = vsel %vm799_vm10, %v855_v63, %v851_v50  ;;  %v1114_v63 = vrot.slane %v3135_v10, %v2704_v30  ;;  %v1122_v50 = vrot.slane %v3135_v10, %v3097_v4 }
 0x2a3   :  { %v888_v14 = vpop.xlane.xlu1 %887  ;;  %v843_v51 = vpop.xlane.xlu0 %842 }
 0x2a4   :  { %v864_v54 = vrot.slane %v843_v51, %v797_v40  ;;  %v905_v48 = vrot.slane %v888_v14, %v792_v41  ;;  %v1118_v14 = vrot.slane %v3135_v10, %v3092_v8  ;;  %v3174_v51 = vld [vmem:[%s3408_s5] sm:$0xff] }
 0x2a6   :  { %v865_v31 = vsel %vm799_vm10, %v864_v54, %v860_v53  ;;  %v1126_v53 = vrot.slane %v3135_v10, %v3100_v49  ;;  %v1130_v54 = vrot.slane %v3135_v10, %v3103_v7  ;;  %v3423_v10 = vrot.slane %v3125_v32, %v2701_v29 }
 0x2a7   :  { %v891_v62 = vpop.xlane.xlu0 %890  ;;  %v866_v56 = vsel %vm810_vm11, %v865_v31, %v856_v20  ;;  %v894_v35 = vpop.xlane.xlu1 %893 }
 0x2a8   :  { %v868_v5 = vsel %vm813_vm12, %v866_v56, 0.0  ;;  %v909_v47 = vrot.slane %v891_v62, %v797_v40  ;;  %v914_v59 = vrot.slane %v894_v35, %v792_v41  ;;  %v3195_v35 = vld [vmem:[%s3408_s5 + $0x8] sm:$0xf] }
 0x2a9   :  { %869 = vadd.xlane.f32.xlu0 %v868_v5 }
 0x2aa   :  { %v910_v33 = vsel %vm799_vm10, %v909_v47, %v905_v48  ;;  %v1194_v48 = vrot.slane %v3174_v51, %v2701_v29 }
 0x2ab   :  { %v897_v52 = vpop.xlane.xlu0 %896 }
 0x2ac   :  { %v918_v18 = vrot.slane %v897_v52, %v797_v40  ;;  %v1190_v52 = vrot.slane %v3174_v51, %v2693_v27 }
 0x2ae   :  { %v919_v38 = vsel %vm799_vm10, %v918_v18, %v914_v59  ;;  %v1198_v59 = vrot.slane %v3174_v51, %v2696_v28  ;;  %v3205_v18 = vld [vmem:[#allocation10] sm:$0xff] }
 0x2af   :  { %v920_v1 = vsel %vm810_vm11, %v919_v38, %v910_v33  ;;  %v1202_v33 = vrot.slane %v3174_v51, %v2704_v30 }
 0x2b0   :  { %v922_v3 = vsel %vm813_vm12, %v920_v1, 0.0 }
 0x2b1   :  { %923 = vadd.xlane.f32.xlu1 %v922_v3 }
 0x2b5   :  { %2041 = vadd.xlane.f32.xlu1 %v3057_v6  ;;  %v3107_v6 = vld [vmem:[#allocation9 + $0x1] ss:$4 sm:$0xff] }
 0x2b6   :  { %v1012_v2 = vrot.slane %v3107_v6, %v2693_v27  ;;  %v1016_v61 = vrot.slane %v3107_v6, %v2701_v29  ;;  %v1020_v40 = vrot.slane %v3107_v6, %v2696_v28  ;;  %v1024_v46 = vrot.slane %v3107_v6, %v2704_v30 }
 0x2b7   :  { %v1028_v9 = vrot.slane %v3107_v6, %v3092_v8  ;;  %v1032_v41 = vrot.slane %v3107_v6, %v3097_v4  ;;  %v1036_v57 = vrot.slane %v3107_v6, %v3100_v49  ;;  %v1040_v43 = vrot.slane %v3107_v6, %v3103_v7 }
 0x32e   :  { %v816_v45 = vpop.xlane.xlu1 %815 }
 0x32f   :  { %v3197_v47 = vmul.f32 0.015625, %v816_v45 }
 0x331   :  { %v991_v62 = vmul.f32 %v934_v13, %v3197_v47  ;;  %v992_v3 = vmul.f32 %v938_v19, %v3197_v47  ;;  %v993_v5 = vmul.f32 %v942_v21, %v3197_v47  ;;  %v1001_v6 = vmul.f32 %v974_v60, %v3197_v47 }
 0x332   :  { %v3425_v60 = vrot.slane %v3174_v51, %v3092_v8 }
 0x336   :  { %v870_v24 = vpop.xlane.xlu0 %869 }
 0x337   :  { %v3184_v31 = vmul.f32 0.015625, %v870_v24 }
 0x339   :  { %v1069_v15 = vmul.f32 %v1012_v2, %v3184_v31  ;;  %v1070_v1 = vmul.f32 %v1016_v61, %v3184_v31  ;;  %v1071_v45 = vmul.f32 %v1020_v40, %v3184_v31  ;;  %v1072_v13 = vmul.f32 %v1024_v46, %v3184_v31 }
 0x33a   :  { %v994_v2 = vmul.f32 %v946_v42, %v3197_v47  ;;  %v1073_v19 = vmul.f32 %v1028_v9, %v3184_v31  ;;  %v995_v61 = vmul.f32 %v950_v39, %v3197_v47  ;;  %v1074_v40 = vmul.f32 %v1032_v41, %v3184_v31 }
 0x33b   :  { %v1075_v46 = vmul.f32 %v1036_v57, %v3184_v31  ;;  %v1082_v38 = vadd.f32 %v1070_v1, %v992_v3  ;;  %v1083_v9 = vadd.f32 %v1071_v45, %v993_v5  ;;  %v996_v39 = vmul.f32 %v954_v23, %v3197_v47 }
 0x33c   :  { %v1084_v20 = vadd.f32 %v1072_v13, %v994_v2  ;;  %v997_v41 = vmul.f32 %v958_v34, %v3197_v47  ;;  %v1085_v57 = vadd.f32 %v1073_v19, %v995_v61  ;;  %v999_v23 = vmul.f32 %v966_v22, %v3197_v47 }
 0x33d   :  { %v1076_v34 = vmul.f32 %v1040_v43, %v3184_v31  ;;  %v3427_v2 = vrot.slane %v3125_v32, %v2696_v28  ;;  %v3428_v19 = vrot.slane %v3153_v26, %v2701_v29 }
 0x33e   :  { %v924_v56 = vpop.xlane.xlu1 %923  ;;  %v1087_v16 = vadd.f32 %v1075_v46, %v997_v41  ;;  %v3429_v46 = vrot.slane %v3125_v32, %v2704_v30  ;;  %v3433_v32 = vrot.slane %v3205_v18, %v2701_v29 }
 0x33f   :  { %v3244_v55 = vmul.f32 0.015625, %v924_v56  ;;  %v1081_v56 = vadd.f32 %v1069_v15, %v991_v62  ;;  %v1079_v13 = vmul.f32 %v3427_v2, %v3184_v31 }
 0x341   :  { %v1159_v24 = vmul.f32 %v1102_v0, %v3244_v55  ;;  %v1160_v21 = vmul.f32 %v1106_v11, %v3244_v55  ;;  %v1161_v36 = vmul.f32 %v1110_v12, %v3244_v55  ;;  %v1162_v42 = vmul.f32 %v1114_v63, %v3244_v55 }
 0x342   :  { %v1163_v44 = vmul.f32 %v1118_v14, %v3244_v55  ;;  %v1164_v15 = vmul.f32 %v1122_v50, %v3244_v55  ;;  %v998_v14 = vmul.f32 %v962_v37, %v3197_v47  ;;  %v1165_v50 = vmul.f32 %v1126_v53, %v3244_v55 }
 0x343   :  { %v1171_v0 = vadd.f32 %v1159_v24, %v1081_v56  ;;  %v1172_v11 = vadd.f32 %v1160_v21, %v1082_v38  ;;  %v1173_v12 = vadd.f32 %v1161_v36, %v1083_v9  ;;  %v1174_v63 = vadd.f32 %v1162_v42, %v1084_v20 }
 0x344   :  { %v1000_v36 = vmul.f32 %v970_v58, %v3197_v47  ;;  %v1086_v20 = vadd.f32 %v1074_v40, %v996_v39  ;;  %v1175_v37 = vadd.f32 %v1163_v44, %v1085_v57  ;;  %v1166_v22 = vmul.f32 %v1130_v54, %v3244_v55 }
 0x345   :  { %v1247_v62 = vadd.f32 %v1190_v52, %v1171_v0  ;;  %v1248_v5 = vadd.f32 %v1194_v48, %v1172_v11  ;;  %v1249_v38 = vadd.f32 %v1198_v59, %v1173_v12  ;;  %v1077_v58 = vmul.f32 %v1044_v25, %v3184_v31 }
 0x346   :  { %v1176_v43 = vadd.f32 %v1164_v15, %v1086_v20  ;;  %v1250_v44 = vadd.f32 %v1202_v33, %v1174_v63  ;;  %v1078_v53 = vmul.f32 %v3423_v10, %v3184_v31  ;;  %v1088_v54 = vadd.f32 %v1076_v34, %v998_v14 }
 0x347   :  { %v3424_v52 = vrot.slane %v3153_v26, %v2693_v27  ;;  %v1177_v59 = vadd.f32 %v1165_v50, %v1087_v16  ;;  %v1251_v1 = vadd.f32 %v3425_v60, %v1175_v37  ;;  %v1259_v3 = vmax.f32 %v1247_v62, 0.0 }
 0x348   :  { %v1260_v25 = vmax.f32 %v1248_v5, 0.0  ;;  %v1261_v45 = vmax.f32 %v1249_v38, 0.0  ;;  %v3426_v33 = vrot.slane %v3094_v17, %v2704_v30  ;;  %v1168_v61 = vmul.f32 %v3428_v19, %v3244_v55 }
 0x349   :  { %v1167_v48 = vmul.f32 %v3424_v52, %v3244_v55  ;;  %v1178_v40 = vadd.f32 %v1166_v22, %v1088_v54  ;;  %v1080_v56 = vmul.f32 %v3429_v46, %v3184_v31  ;;  %v1089_v21 = vadd.f32 %v1077_v58, %v999_v23 }
 0x34a   :  { %v1002_v24 = vmul.f32 %v3426_v33, %v3197_v47  ;;  %v3430_v17 = vrot.slane %v3174_v51, %v3097_v4  ;;  %v1262_v42 = vmax.f32 %v1250_v44, 0.0  ;;  %v1090_v9 = vadd.f32 %v1078_v53, %v1000_v36  ;;  %v1272_v53 = vld [vmem:[#allocation10 + $0x8] sm:$0xf] }
 0x34b   :  { %v3431_v39 = vrot.slane %v3153_v26, %v2696_v28  ;;  %v3432_v57 = vrot.slane %v3205_v18, %v2693_v27  ;;  %v1336_v31 = vmul.f32 %v3433_v32, %v1260_v25  ;;  %v1179_v0 = vadd.f32 %v1167_v48, %v1089_v21 }
 0x34c   :  { %v1252_v47 = vadd.f32 %v3430_v17, %v1176_v43  ;;  %v3434_v11 = vrot.slane %v3174_v51, %v3100_v49  ;;  %v1263_v63 = vmax.f32 %v1251_v1, 0.0  ;;  %v3435_v14 = vrot.slane %v3205_v18, %v2696_v28 }
 0x34d   :  { %v1169_v41 = vmul.f32 %v3431_v39, %v3244_v55  ;;  %v1335_v15 = vmul.f32 %v3432_v57, %v1259_v3  ;;  %v1091_v34 = vadd.f32 %v1079_v13, %v1001_v6  ;;  %v3436_v50 = vrot.slane %v3153_v26, %v2704_v30 }
 0x34e   :  { %v1253_v12 = vadd.f32 %v3434_v11, %v1177_v59  ;;  %v1337_v23 = vmul.f32 %v3435_v14, %v1261_v45  ;;  %v1180_v20 = vadd.f32 %v1168_v61, %v1090_v9  ;;  %v3437_v16 = vrot.slane %v3174_v51, %v3103_v7 }
 0x34f   :  { %v1170_v36 = vmul.f32 %v3436_v50, %v3244_v55  ;;  %v1264_v22 = vmax.f32 %v1252_v47, 0.0  ;;  %v3438_v62 = vrot.slane %v3205_v18, %v2704_v30  ;;  %v1348_v38 = vsel %vm1347_vm9, %v1335_v15, 0.0 }
 0x350   :  { %v1254_v37 = vadd.f32 %v3437_v16, %v1178_v40  ;;  %v1349_v58 = vsel %vm1347_vm9, %v1336_v31, 0.0  ;;  %v1092_v6 = vadd.f32 %v1080_v56, %v1002_v24  ;;  %v1181_v43 = vadd.f32 %v1169_v41, %v1091_v34 }
 0x351   :  { %v1338_v5 = vmul.f32 %v3438_v62, %v1262_v42  ;;  %v1302_v26 = vrot.slane %v3205_v18, %v3100_v49  ;;  %v1350_v55 = vadd.f32 %v1349_v58, %v1348_v38  ;;  %v3439_v44 = vrot.slane %v3195_v35, %v2693_v27 }
 0x352   :  { %v1265_v10 = vmax.f32 %v1253_v12, 0.0  ;;  %v3440_v54 = vrot.slane %v3205_v18, %v3092_v8  ;;  %v1351_v48 = vsel %vm1347_vm9, %v1337_v23, 0.0  ;;  %v1182_v59 = vadd.f32 %v1170_v36, %v1092_v6 }
 0x353   :  { %v1255_v51 = vadd.f32 %v3439_v44, %v1179_v0  ;;  %v1234_v60 = vrot.slane %v3195_v35, %v2704_v30  ;;  %v1306_v49 = vrot.slane %v3205_v18, %v3103_v7  ;;  %v1352_v1 = vadd.f32 %v1351_v48, %v1350_v55 }
 0x354   :  { %v1339_v52 = vmul.f32 %v3440_v54, %v1263_v63  ;;  %v3441_v3 = vrot.slane %v3195_v35, %v2701_v29  ;;  %v1266_v45 = vmax.f32 %v1254_v37, 0.0  ;;  %v3442_v33 = vrot.slane %v3205_v18, %v3097_v4 }
 0x355   :  { %v1353_v24 = vsel %vm1347_vm9, %v1338_v5, 0.0  ;;  %v1310_v2 = vrot.slane %v1272_v53, %v2693_v27  ;;  %v3443_v19 = vrot.slane %v3195_v35, %v2696_v28  ;;  %v1267_v7 = vmax.f32 %v1255_v51, 0.0 }
 0x356   :  { %v1256_v25 = vadd.f32 %v3441_v3, %v1180_v20  ;;  %v1340_v8 = vmul.f32 %v3442_v33, %v1264_v22  ;;  %v1354_v13 = vadd.f32 %v1353_v24, %v1352_v1  ;;  %v1341_v40 = vmul.f32 %v1302_v26, %v1265_v10 }
 0x357   :  { %v1257_v61 = vadd.f32 %v3443_v19, %v1181_v43  ;;  %v1355_v46 = vsel %vm1347_vm9, %v1339_v52, 0.0  ;;  %v1314_v56 = vrot.slane %v1272_v53, %v2701_v29  ;;  %v1258_v17 = vadd.f32 %v1234_v60, %v1182_v59 }
 0x358   :  { %v1356_v21 = vadd.f32 %v1355_v46, %v1354_v13  ;;  %v1268_v47 = vmax.f32 %v1256_v25, 0.0  ;;  %v1342_v4 = vmul.f32 %v1306_v49, %v1266_v45  ;;  %v1357_v18 = vsel %vm1347_vm9, %v1340_v8, 0.0 }
 0x359   :  { %v1269_v9 = vmax.f32 %v1257_v61, 0.0  ;;  %v1318_v27 = vrot.slane %v1272_v53, %v2696_v28  ;;  %v1343_v39 = vmul.f32 %v1310_v2, %v1267_v7  ;;  %v1359_v35 = vsel %vm1347_vm9, %v1341_v40, 0.0 }
 0x35a   :  { %v1358_v42 = vadd.f32 %v1357_v18, %v1356_v21  ;;  %v1270_v57 = vmax.f32 %v1258_v17, 0.0  ;;  %v1322_v15 = vrot.slane %v1272_v53, %v2704_v30  ;;  %v1344_v32 = vmul.f32 %v1314_v56, %v1268_v47  ;;  %v2042_v30 = vpop.xlane.xlu1 %2041 }
 0x35b   :  { %v1361_v29 = vsel %vm1347_vm9, %v1342_v4, 0.0  ;;  %v1345_v0 = vmul.f32 %v1318_v27, %v1269_v9  ;;  %v1363_v11 = vsel %vm1347_vm9, %v1343_v39, 0.0  ;;  %v2045_v20 = vstv %s3415_s12 }
 0x35c   :  { %v1360_v41 = vadd.f32 %v1359_v35, %v1358_v42  ;;  %v1346_v63 = vmul.f32 %v1322_v15, %v1270_v57  ;;  %v1365_v14 = vsel %vm1347_vm9, %v1344_v32, 0.0 }
 0x35d   :  { %v1367_v28 = vsel %vm1347_vm9, %v1345_v0, 0.0 }
 0x35e   :  { %v1362_v31 = vadd.f32 %v1361_v29, %v1360_v41  ;;  %v1369_v50 = vsel %vm1347_vm9, %v1346_v63, 0.0 }
 0x360   :  { %v1364_v12 = vadd.f32 %v1363_v11, %v1362_v31 }
 0x362   :  { %v1366_v23 = vadd.f32 %v1365_v14, %v1364_v12 }
 0x364   :  { %v1368_v34 = vadd.f32 %v1367_v28, %v1366_v23 }
 0x366   :  { %v1370_v36 = vadd.f32 %v1369_v50, %v1368_v34 }
 0x368   :  { %1371 = vadd.xlane.f32.xlu0 %v1370_v36 }
 0x3f5   :  { %v1372_v16 = vpop.xlane.xlu0 %1371 }
 0x3f6   :  { %v2043_v37 = vadd.f32 %v2042_v30, %v1372_v16 }
 0x3f8   :  { %v2046_v22 = vadd.f32 %v2045_v20, %v2043_v37 }
 0x3fa   :  { %2048 = vst.msk [vmem:[%s3416_s13] sm:$0x3] %vm2047_vm13, %v2046_v22 }
 0x3fb   :  { %2053 = vsyncpa [#allocation5], 1 }
 0x3fc   :  { %2054 = vsyncpa [#allocation11], 1 }
 0x3fd   :  { %2055 = vsyncpa [#allocation14], 1 }
 0x3fe   :  { %2056 = vsyncpa [#allocation17], 1 }
 0x3ff   :  { %2057 = vsyncpa [#allocation6], 1 }
 0x400   :  { %2058 = vsyncpa [#allocation7], 1 }

</bundles_post_ra>
